<compile_context>
chip_gen: v7x
topology: tpu7x:2x2x1
jax: 0.10.0
libtpu: 0.0.40
codegen_flags: <defaults>
</compile_context>

<pallas_src>
import functools
import math

import jax
import jax.numpy as jnp
import numpy as np
from jax.experimental import pallas as pl
from jax.experimental.pallas import tpu as pltpu


# -----------------------------------------------------------------------------
# helpers
# -----------------------------------------------------------------------------
def _round_up(x, m):
    return ((x + m - 1) // m) * m


def _m_tiling(M):
    """Return (TM, Mp).  Single full-M block when small; 512-row tiles when big."""
    if M <= 1024:
        return M, M                      # block == full dim -> no (8,128) constraint, no pad
    return 512, _round_up(M, 512)


def _n_tiling(N):
    """Full-N block unless N is a large multiple of 128 (then lane-dense 128..512 tiles)."""
    if N % 128 != 0 or N <= 512:
        return N                         # block == full dim (masked stores only if N<128)
    for t in (512, 384, 256, 128):
        if N % t == 0:
            return t
    return N


# -----------------------------------------------------------------------------
# Pallas kernel: single-K-step matmul with fused bias + (optional) ReLU epilogue
#   A (TM, K) bf16  x  W (K, TN) bf16  -> f32 MXU acc -> +bias -> ReLU -> bf16 out
# -----------------------------------------------------------------------------
def _matmul_bias_act_kernel(a_ref, b_ref, bias_ref, o_ref, *, relu):
    acc = jnp.dot(a_ref[...], b_ref[...], preferred_element_type=jnp.float32)
    out = acc + bias_ref[...]            # epilogue math stays in f32 (v5e has no bf16 VPU)
    if relu:
        out = jnp.maximum(out, 0.0)
    o_ref[...] = out.astype(o_ref.dtype)


def matmul_bias_act(a_bf16, w_bf16, bias_f32, relu):
    """a: (M, K) bf16; w: (K, N) bf16; bias: (1, N) f32. Returns (M, N) bf16."""
    M, K = a_bf16.shape
    Kw, N = w_bf16.shape
    assert K == Kw
    TM, Mp = _m_tiling(M)
    TN = _n_tiling(N)

    if Mp != M:                          # only for very large M (not hit at demo shapes)
        a_bf16 = jnp.pad(a_bf16, ((0, Mp - M), (0, 0)))

    # consistent VMEM estimate: 2x per pipelined input/output buffer
    est = 2 * (TM * K * 2 + K * TN * 2 + TN * 4 + TM * TN * 2)
    vmem_bytes = int(min(max(2 * est, 16 << 20), 48 << 20))

    out = pl.pallas_call(
        functools.partial(_matmul_bias_act_kernel, relu=relu),
        out_shape=jax.ShapeDtypeStruct((Mp, N), jnp.bfloat16),
        grid=(Mp // TM, N // TN),
        in_specs=[
            pl.BlockSpec((TM, K), lambda i, j: (i, 0)),    # full (unpadded) K per step
            pl.BlockSpec((K, TN), lambda i, j: (0, j)),
            pl.BlockSpec((1, TN), lambda i, j: (0, j)),
        ],
        out_specs=pl.BlockSpec((TM, TN), lambda i, j: (i, j)),
        compiler_params=pltpu.CompilerParams(
            dimension_semantics=("parallel", "parallel"),
            vmem_limit_bytes=vmem_bytes,
        ),
    )(a_bf16, w_bf16, bias_f32)

    if Mp != M:
        out = out[:M, :]
    return out


# -----------------------------------------------------------------------------
# Conv3x3 (valid padding) + folded-BN + ReLU  =  bf16 im2col + fused Pallas matmul
# -----------------------------------------------------------------------------
# TODO(synk): a further win would be streaming im2col inside the kernel (9 shifted
# in-VMEM dots with a row halo) so the 9x patch matrix never hits HBM.
def _im2col_3x3(x_bf16):
    """x: (N, H, W, C) bf16 -> patches (N*oh*ow, 9*C) bf16, tap order (kh, kw, C)."""
    N, H, W, C = x.shape if False else x_bf16.shape
    oh, ow = H - 2, W - 2
    cols = [x_bf16[:, i:i + oh, j:j + ow, :] for i in range(3) for j in range(3)]
    patches = jnp.concatenate(cols, axis=-1)          # already bf16, no f32 blow-up
    return patches.reshape(N * oh * ow, 9 * C), (N, oh, ow)


def conv3x3_bn_relu(x_bf16, w_packed, b_packed):
    """w_packed: (9*cin, cout) bf16 (BN folded); b_packed: (1, cout) f32."""
    patches, (N, oh, ow) = _im2col_3x3(x_bf16)
    cout = w_packed.shape[1]
    out = matmul_bias_act(patches, w_packed, b_packed, relu=True)   # (M, cout) bf16
    return out.reshape(N, oh, ow, cout)


# -----------------------------------------------------------------------------
# MaxPool2d(2,2) — cheap memory-bound glue, kept in bf16 (reshape-max, floor division)
# -----------------------------------------------------------------------------
def maxpool_2x2(x):
    N, H, W, C = x.shape
    h2, w2 = H // 2, W // 2
    x = x[:, :2 * h2, :2 * w2, :]
    return x.reshape(N, h2, 2, w2, 2, C).max(axis=(2, 4))


# -----------------------------------------------------------------------------
# parameters: conv init, eval-mode BN folding, one-time bf16 packing (arrays only!)
# -----------------------------------------------------------------------------
def fold_bn_into_conv(w, b, gamma, beta, mean, var, eps=1e-5):
    """w: (3, 3, cin, cout), b: (cout,). Returns BN-folded (w, b)."""
    scale = gamma / jnp.sqrt(var + eps)
    return w * scale[None, None, None, :], (b - mean) * scale + beta


def _pack(w, b):
    kh, kw, cin, cout = w.shape
    return {
        "w": w.reshape(kh * kw * cin, cout).astype(jnp.bfloat16),   # (K, N) bf16
        "b": b.reshape(1, cout).astype(jnp.float32),                # (1, N) f32
    }


def make_params(in_ch, out_ch, key):
    k1, k2 = jax.random.split(key)

    def conv_init(k, cin, cout):
        std = math.sqrt(2.0 / (9 * cin))
        w = jax.random.normal(k, (3, 3, cin, cout), jnp.float32) * std
        return w, jnp.zeros((cout,), jnp.float32)

    def bn_default(c):
        return (jnp.ones((c,), jnp.float32), jnp.zeros((c,), jnp.float32),
                jnp.zeros((c,), jnp.float32), jnp.ones((c,), jnp.float32))

    w1, b1 = fold_bn_into_conv(*conv_init(k1, in_ch, out_ch), *bn_default(out_ch))
    w2, b2 = fold_bn_into_conv(*conv_init(k2, out_ch, out_ch), *bn_default(out_ch))
    return {"conv1": _pack(w1, b1), "conv2": _pack(w2, b2)}


# -----------------------------------------------------------------------------
# _EncoderBlock forward (NCHW in / NCHW f32 out, eval-mode semantics)
# -----------------------------------------------------------------------------
def encoder_block_forward(params, x_nchw):
    # cast to bf16 BEFORE the transpose / im2col -> half the glue HBM traffic
    x = jnp.transpose(x_nchw.astype(jnp.bfloat16), (0, 2, 3, 1))        # NCHW -> NHWC
    h = conv3x3_bn_relu(x, params["conv1"]["w"], params["conv1"]["b"])  # conv+BN+ReLU
    h = conv3x3_bn_relu(h, params["conv2"]["w"], params["conv2"]["b"])  # conv+BN+ReLU
    # dropout=False module default (and eval-mode dropout is identity)
    h = maxpool_2x2(h)                                                  # MaxPool2d(2,2)
    return jnp.transpose(h, (0, 3, 1, 2)).astype(jnp.float32)           # NHWC -> NCHW f32


# -----------------------------------------------------------------------------
# pure-JAX reference (same bf16-rounded inputs/weights) for a sanity tolerance check
# -----------------------------------------------------------------------------
def _reference_forward(params, x_nchw):
    x = jnp.transpose(x_nchw.astype(jnp.bfloat16).astype(jnp.float32), (0, 2, 3, 1))

    def conv(x, p):
        K, cout = p["w"].shape
        cin = K // 9
        w = p["w"].astype(jnp.float32).reshape(3, 3, cin, cout)         # HWIO
        y = jax.lax.conv_general_dilated(
            x, w, window_strides=(1, 1), padding="VALID",
            dimension_numbers=("NHWC", "HWIO", "NHWC"))
        return jnp.maximum(y + p["b"][0], 0.0)

    h = conv(x, params["conv1"])
    h = conv(h, params["conv2"])
    h = maxpool_2x2(h)
    return jnp.transpose(h, (0, 3, 1, 2))


# -----------------------------------------------------------------------------
if __name__ == "__main__":
    IN_CH, OUT_CH = 4, 32
    key = jax.random.PRNGKey(0)
    k_params, k_input = jax.random.split(key)

    params = make_params(IN_CH, OUT_CH, k_params)
    x = jax.random.normal(k_input, (2, IN_CH, 16, 16), jnp.float32)     # NCHW

    out = jax.jit(encoder_block_forward)(params, x)
    jax.block_until_ready(out)

    # 16 -> conv3 (valid) 14 -> conv3 (valid) 12 -> maxpool2 -> 6
    assert out.shape == (2, OUT_CH, 6, 6), out.shape

    ref = jax.jit(_reference_forward)(params, x)
    jax.block_until_ready(ref)
    err = float(jnp.max(jnp.abs(out - ref)))
    assert err < 0.1, f"max abs err vs reference too large: {err}"

    print("KERNEL_OK")
</pallas_src>

<mosaic_0001>
module attributes {stable_mosaic.version = 11 : i64} {
  func.func @_matmul_bias_act_kernel(%arg0: i32, %arg1: i32, %arg2: memref<392x36xbf16, #tpu.memory_space<vmem>>, %arg3: memref<36x32xbf16, #tpu.memory_space<vmem>>, %arg4: memref<1x32xf32, #tpu.memory_space<vmem>>, %arg5: memref<392x32xbf16, #tpu.memory_space<vmem>>) attributes {dimension_semantics = [#tpu.dimension_semantics<parallel>, #tpu.dimension_semantics<parallel>], iteration_bounds = array<i64: 1, 1>, scalar_prefetch = 0 : i64, scratch_operands = 0 : i64, tpu.core_type = #tpu.core_type<tc>, window_params = [{transform_indices = @transform_0, window_bounds = array<i64: 392, 36>}, {transform_indices = @transform_1, window_bounds = array<i64: 36, 32>}, {transform_indices = @transform_2, window_bounds = array<i64: 1, 32>}, {transform_indices = @transform_3, window_bounds = array<i64: 392, 32>}]} {
    %c0 = arith.constant 0 : index
    %c0_0 = arith.constant 0 : index
    %0 = vector.load %arg2[%c0, %c0_0] : memref<392x36xbf16, #tpu.memory_space<vmem>>, vector<392x36xbf16>
    %c0_1 = arith.constant 0 : index
    %c0_2 = arith.constant 0 : index
    %1 = vector.load %arg3[%c0_1, %c0_2] : memref<36x32xbf16, #tpu.memory_space<vmem>>, vector<36x32xbf16>
    %cst = arith.constant dense<0.000000e+00> : vector<392x32xf32>
    %2 = tpu.matmul %0, %1, %cst {dimension_numbers = #tpu.dot_dimension_numbers<[1], [0], [0], [1], [0, 0, 1, 1], [], []>} : vector<392x36xbf16>, vector<36x32xbf16>, vector<392x32xf32> -> vector<392x32xf32>
    %c0_3 = arith.constant 0 : index
    %c0_4 = arith.constant 0 : index
    %3 = vector.load %arg4[%c0_3, %c0_4] : memref<1x32xf32, #tpu.memory_space<vmem>>, vector<1x32xf32>
    %4 = vector.broadcast %3 : vector<1x32xf32> to vector<392x32xf32>
    %5 = arith.addf %2, %4 : vector<392x32xf32>
    %cst_5 = arith.constant 0.000000e+00 : f32
    %6 = vector.broadcast %cst_5 : f32 to vector<392x32xf32>
    %7 = arith.maximumf %5, %6 : vector<392x32xf32>
    %8 = arith.truncf %7 : vector<392x32xf32> to vector<392x32xbf16>
    %c0_6 = arith.constant 0 : index
    %c0_7 = arith.constant 0 : index
    %9 = vector.load %arg5[%c0_6, %c0_7] : memref<392x32xbf16, #tpu.memory_space<vmem>>, vector<392x32xbf16>
    tpu.vector_store %arg5[%c0_6, %c0_7], %8 {strides = array<i32>} : memref<392x32xbf16, #tpu.memory_space<vmem>>, vector<392x32xbf16>,
    return
  }
  func.func @transform_0(%arg0: i32, %arg1: i32) -> (i32, i32) {
    %c0_i32 = arith.constant 0 : i32
    %c0_i32_0 = arith.constant 0 : i32
    return %arg0, %c0_i32 : i32, i32
  }
  func.func @transform_1(%arg0: i32, %arg1: i32) -> (i32, i32) {
    %c0_i32 = arith.constant 0 : i32
    %c0_i32_0 = arith.constant 0 : i32
    return %c0_i32, %arg1 : i32, i32
  }
  func.func @transform_2(%arg0: i32, %arg1: i32) -> (i32, i32) {
    %c0_i32 = arith.constant 0 : i32
    %c0_i32_0 = arith.constant 0 : i32
    return %c0_i32, %arg1 : i32, i32
  }
  func.func @transform_3(%arg0: i32, %arg1: i32) -> (i32, i32) {
    %c0_i32 = arith.constant 0 : i32
    return %arg0, %arg1 : i32, i32
  }
}

module attributes {stable_mosaic.version = 11 : i64} {
  func.func @_matmul_bias_act_kernel(%arg0: i32, %arg1: i32, %arg2: memref<288x288xbf16, #tpu.memory_space<vmem>>, %arg3: memref<288x32xbf16, #tpu.memory_space<vmem>>, %arg4: memref<1x32xf32, #tpu.memory_space<vmem>>, %arg5: memref<288x32xbf16, #tpu.memory_space<vmem>>) attributes {dimension_semantics = [#tpu.dimension_semantics<parallel>, #tpu.dimension_semantics<parallel>], iteration_bounds = array<i64: 1, 1>, scalar_prefetch = 0 : i64, scratch_operands = 0 : i64, tpu.core_type = #tpu.core_type<tc>, window_params = [{transform_indices = @transform_0, window_bounds = array<i64: 288, 288>}, {transform_indices = @transform_1, window_bounds = array<i64: 288, 32>}, {transform_indices = @transform_2, window_bounds = array<i64: 1, 32>}, {transform_indices = @transform_3, window_bounds = array<i64: 288, 32>}]} {
    %c0 = arith.constant 0 : index
    %c0_0 = arith.constant 0 : index
    %0 = vector.load %arg2[%c0, %c0_0] : memref<288x288xbf16, #tpu.memory_space<vmem>>, vector<288x288xbf16>
    %c0_1 = arith.constant 0 : index
    %c0_2 = arith.constant 0 : index
    %1 = vector.load %arg3[%c0_1, %c0_2] : memref<288x32xbf16, #tpu.memory_space<vmem>>, vector<288x32xbf16>
    %cst = arith.constant dense<0.000000e+00> : vector<288x32xf32>
    %2 = tpu.matmul %0, %1, %cst {dimension_numbers = #tpu.dot_dimension_numbers<[1], [0], [0], [1], [0, 0, 1, 1], [], []>} : vector<288x288xbf16>, vector<288x32xbf16>, vector<288x32xf32> -> vector<288x32xf32>
    %c0_3 = arith.constant 0 : index
    %c0_4 = arith.constant 0 : index
    %3 = vector.load %arg4[%c0_3, %c0_4] : memref<1x32xf32, #tpu.memory_space<vmem>>, vector<1x32xf32>
    %4 = vector.broadcast %3 : vector<1x32xf32> to vector<288x32xf32>
    %5 = arith.addf %2, %4 : vector<288x32xf32>
    %cst_5 = arith.constant 0.000000e+00 : f32
    %6 = vector.broadcast %cst_5 : f32 to vector<288x32xf32>
    %7 = arith.maximumf %5, %6 : vector<288x32xf32>
    %8 = arith.truncf %7 : vector<288x32xf32> to vector<288x32xbf16>
    %c0_6 = arith.constant 0 : index
    %c0_7 = arith.constant 0 : index
    %9 = vector.load %arg5[%c0_6, %c0_7] : memref<288x32xbf16, #tpu.memory_space<vmem>>, vector<288x32xbf16>
    tpu.vector_store %arg5[%c0_6, %c0_7], %8 {strides = array<i32>} : memref<288x32xbf16, #tpu.memory_space<vmem>>, vector<288x32xbf16>,
    return
  }
  func.func @transform_0(%arg0: i32, %arg1: i32) -> (i32, i32) {
    %c0_i32 = arith.constant 0 : i32
    %c0_i32_0 = arith.constant 0 : i32
    return %arg0, %c0_i32 : i32, i32
  }
  func.func @transform_1(%arg0: i32, %arg1: i32) -> (i32, i32) {
    %c0_i32 = arith.constant 0 : i32
    %c0_i32_0 = arith.constant 0 : i32
    return %c0_i32, %arg1 : i32, i32
  }
  func.func @transform_2(%arg0: i32, %arg1: i32) -> (i32, i32) {
    %c0_i32 = arith.constant 0 : i32
    %c0_i32_0 = arith.constant 0 : i32
    return %c0_i32, %arg1 : i32, i32
  }
  func.func @transform_3(%arg0: i32, %arg1: i32) -> (i32, i32) {
    %c0_i32 = arith.constant 0 : i32
    return %arg0, %arg1 : i32, i32
  }
}

</mosaic_0001>

<bundles_post_ra>
// kernel: encoder_block_forward.2
= control target key start
LH: loop header
LB: loop body
LE: loop exit
PB: predicated region body
PF: predicated region fallthrough
CT: control target
= control target key end

     0   :  { %v1148_v0 = vmov 0.0   ;;  %vm1149_vm0 = vmmov 0   ;;  %vm290_vm1 = vcmask 1041408   ;;  %vm214_vm2 = vcmask 293888   ;;  %s1585_s1 = inlined_call_operand.vmem [shape: bf16[36,32], index: 1, kind: input, shape index: {}]   ;;  %s1586_s0 = inlined_call_operand.vmem [shape: bf16[392,36], index: 0, kind: input, shape index: {}]   ;;  %s1587_s2 = inlined_call_operand.vmem [shape: f32[1,32], index: 2, kind: input, shape index: {}]   ;;  %s1588_s3 = inlined_call_operand.vmem [shape: bf16[392,32], index: 3, kind: output, shape index: {}]  }
   0x1   :  { %1006 = vmatprep.subr.bf16.mxu0 %v1148_v0  ;;  %v1120_v1 = vld [vmem:[%s1585_s1] sm:$0xff]   ;;  %1112 = vmatprep.subr.bf16.mxu1 %v1148_v0  ;;  %v1121_v2 = vld [vmem:[%s1585_s1 + $0x8] sm:$0xff]   ;;  %v1122_v3 = vld [vmem:[%s1585_s1 + $0x10] ss:$0 sps:$4 sm:$0x33]   ;;  %vm772_vm3 = vcmask 257024  }
   0x2   :  { %1012 = vmatprep.mubr.msk.bf16.mxu0 %vm1149_vm0, %v1148_v0  ;;  %1064 = vmatprep.mubr.msk.bf16.mxu1 %vm1149_vm0, %v1148_v0  ;;  %v292_v4 = vsel %vm290_vm1, %v1122_v3, 0  ;;  %v1123_v5 = vld [vmem:[%s1586_s0] sm:$0xff]   ;;  %v1124_v6 = vld [vmem:[%s1586_s0 + $0x68] sm:$0xff]   ;;  %v1126_v8 = vld [vmem:[%s1586_s0 + $0x70] sm:$0xff]  }
   0x3   :  { %1007 = vmatpush3.bf16.msra.mxu0 %v1120_v1  ;;  %1115 = vmatpush3.bf16.msra.mxu1 %v1120_v1  ;;  %v1125_v7 = vld [vmem:[%s1586_s0 + $0x8] sm:$0xff]   ;;  %v1127_v9 = vld [vmem:[%s1586_s0 + $0x10] sm:$0xff]   ;;  %v1128_v10 = vld [vmem:[%s1586_s0 + $0x78] sm:$0xff]  }
   0x4   :  { %1008 = vmatprep.subr.bf16.mxu0 %v1148_v0  ;;  %1113 = vmatprep.subr.bf16.mxu1 %v1148_v0  ;;  %v1129_v11 = vld [vmem:[%s1586_s0 + $0x18] sm:$0xff]   ;;  %v1130_v12 = vld [vmem:[%s1586_s0 + $0x80] sm:$0xff]   ;;  %v1132_v14 = vld [vmem:[%s1586_s0 + $0x88] sm:$0xff]  }
   0x5   :  { %v1131_v13 = vld [vmem:[%s1586_s0 + $0x20] sm:$0xff]   ;;  %v1133_v15 = vld [vmem:[%s1586_s0 + $0x28] sm:$0xff]   ;;  %v1134_v16 = vld [vmem:[%s1586_s0 + $0x90] sm:$0xff]  }
   0x6   :  { %v1135_v17 = vld [vmem:[%s1586_s0 + $0x30] sm:$0xff]   ;;  %v1136_v18 = vld [vmem:[%s1586_s0 + $0x98] sm:$0xff]   ;;  %v1138_v20 = vld [vmem:[%s1586_s0 + $0xa0] sm:$0xff]  }
   0x7   :  { %1009 = vmatpush3.bf16.msra.mxu0 %v1121_v2  ;;  %1116 = vmatpush3.bf16.msra.mxu1 %v1121_v2  ;;  %v1137_v19 = vld [vmem:[%s1586_s0 + $0x38] sm:$0xff]   ;;  %v1139_v21 = vld [vmem:[%s1586_s0 + $0x40] sm:$0xff]   ;;  %v1140_v22 = vld [vmem:[%s1586_s0 + $0xa8] sm:$0xff]  }
   0x8   :  { %1010 = vmatprep.subr.bf16.mxu0 %v1148_v0  ;;  %1114 = vmatprep.subr.bf16.mxu1 %v1148_v0  ;;  %v1141_v23 = vld [vmem:[%s1586_s0 + $0x48] sm:$0xff]   ;;  %v1142_v24 = vld [vmem:[%s1586_s0 + $0xb0] sm:$0xff]   ;;  %v1144_v26 = vld [vmem:[%s1586_s0 + $0xb8] sm:$0xff]  }
   0x9   :  { %v1143_v25 = vld [vmem:[%s1586_s0 + $0x50] sm:$0xff]   ;;  %v1145_v27 = vld [vmem:[%s1586_s0 + $0x58] sm:$0xff]   ;;  %v1146_v28 = vld [vmem:[%s1586_s0 + $0xc0] ss:$0 sps:$4 sm:$0xff]  }
   0xa   :  { %v1147_v29 = vld [vmem:[%s1586_s0 + $0x60] sm:$0xff]  }
   0xb   :  { %1011 = vmatpush3.bf16.msra.mxu0 %v292_v4  ;;  %1117 = vmatpush3.bf16.msra.mxu1 %v292_v4  ;;  %v1338_v30 = vld [vmem:[%s1587_s2] ss:$0 sm:$0xff] }
   0xe   :  { %1013 = vmatmul.mubr.msk.bf16.vlgmr.msra.gmra.mrb[0].mxu0 %vm214_vm2, %v1123_v5  ;;  %1065 = vmatmul.mubr.msk.bf16.vlgmr.msra.gmra.mrb[0].mxu1 %vm214_vm2, %v1124_v6 }
   0xf   :  { %1016 = vmatprep.mubr.msk.bf16.mxu0 %vm1149_vm0, %v1148_v0  ;;  %1068 = vmatprep.mubr.msk.bf16.mxu1 %vm1149_vm0, %v1148_v0 }
  0x16   :  { %1017 = vmatmul.mubr.msk.bf16.gmra.mrb[4].mxu0 %vm214_vm2, %v1125_v7  ;;  %1069 = vmatmul.mubr.msk.bf16.gmra.mrb[4].mxu1 %vm214_vm2, %v1126_v8 }
  0x17   :  { %1020 = vmatprep.mubr.msk.bf16.mxu0 %vm1149_vm0, %v1148_v0  ;;  %1072 = vmatprep.mubr.msk.bf16.mxu1 %vm1149_vm0, %v1148_v0 }
  0x1e   :  { %1021 = vmatmul.mubr.msk.bf16.gmra.mrb[8].mxu0 %vm214_vm2, %v1127_v9  ;;  %1073 = vmatmul.mubr.msk.bf16.gmra.mrb[8].mxu1 %vm214_vm2, %v1128_v10 }
  0x1f   :  { %1024 = vmatprep.mubr.msk.bf16.mxu0 %vm1149_vm0, %v1148_v0  ;;  %1076 = vmatprep.mubr.msk.bf16.mxu1 %vm1149_vm0, %v1148_v0 }
  0x26   :  { %1025 = vmatmul.mubr.msk.bf16.gmra.mrb[12].mxu0 %vm214_vm2, %v1129_v11  ;;  %1077 = vmatmul.mubr.msk.bf16.gmra.mrb[12].mxu1 %vm214_vm2, %v1130_v12 }
  0x27   :  { %1028 = vmatprep.mubr.msk.bf16.mxu0 %vm1149_vm0, %v1148_v0  ;;  %1080 = vmatprep.mubr.msk.bf16.mxu1 %vm1149_vm0, %v1148_v0 }
  0x2e   :  { %1029 = vmatmul.mubr.msk.bf16.gmra.mrb[16].mxu0 %vm214_vm2, %v1131_v13  ;;  %1081 = vmatmul.mubr.msk.bf16.gmra.mrb[16].mxu1 %vm214_vm2, %v1132_v14 }
  0x2f   :  { %1032 = vmatprep.mubr.msk.bf16.mxu0 %vm1149_vm0, %v1148_v0  ;;  %1084 = vmatprep.mubr.msk.bf16.mxu1 %vm1149_vm0, %v1148_v0 }
  0x36   :  { %1033 = vmatmul.mubr.msk.bf16.gmra.mrb[20].mxu0 %vm214_vm2, %v1133_v15  ;;  %1085 = vmatmul.mubr.msk.bf16.gmra.mrb[20].mxu1 %vm214_vm2, %v1134_v16 }
  0x37   :  { %1036 = vmatprep.mubr.msk.bf16.mxu0 %vm1149_vm0, %v1148_v0  ;;  %1088 = vmatprep.mubr.msk.bf16.mxu1 %vm1149_vm0, %v1148_v0 }
  0x3e   :  { %1037 = vmatmul.mubr.msk.bf16.gmra.mrb[24].mxu0 %vm214_vm2, %v1135_v17  ;;  %1089 = vmatmul.mubr.msk.bf16.gmra.mrb[24].mxu1 %vm214_vm2, %v1136_v18 }
  0x3f   :  { %1040 = vmatprep.mubr.msk.bf16.mxu0 %vm1149_vm0, %v1148_v0  ;;  %1092 = vmatprep.mubr.msk.bf16.mxu1 %vm1149_vm0, %v1148_v0 }
  0x46   :  { %1041 = vmatmul.mubr.msk.bf16.gmra.mrb[28].mxu0 %vm214_vm2, %v1137_v19  ;;  %1093 = vmatmul.mubr.msk.bf16.gmra.mrb[28].mxu1 %vm214_vm2, %v1138_v20 }
  0x47   :  { %1044 = vmatprep.mubr.msk.bf16.mxu0 %vm1149_vm0, %v1148_v0  ;;  %1096 = vmatprep.mubr.msk.bf16.mxu1 %vm1149_vm0, %v1148_v0 }
  0x4e   :  { %1045 = vmatmul.mubr.msk.bf16.gmra.mrb[32].mxu0 %vm214_vm2, %v1139_v21  ;;  %1097 = vmatmul.mubr.msk.bf16.gmra.mrb[32].mxu1 %vm214_vm2, %v1140_v22 }
  0x4f   :  { %1048 = vmatprep.mubr.msk.bf16.mxu0 %vm1149_vm0, %v1148_v0  ;;  %1100 = vmatprep.mubr.msk.bf16.mxu1 %vm1149_vm0, %v1148_v0 }
  0x56   :  { %1049 = vmatmul.mubr.msk.bf16.gmra.mrb[36].mxu0 %vm214_vm2, %v1141_v23  ;;  %1101 = vmatmul.mubr.msk.bf16.gmra.mrb[36].mxu1 %vm214_vm2, %v1142_v24 }
  0x57   :  { %1052 = vmatprep.mubr.msk.bf16.mxu0 %vm1149_vm0, %v1148_v0  ;;  %1104 = vmatprep.mubr.msk.bf16.mxu1 %vm1149_vm0, %v1148_v0 }
  0x5e   :  { %1053 = vmatmul.mubr.msk.bf16.gmra.mrb[40].mxu0 %vm214_vm2, %v1143_v25  ;;  %1105 = vmatmul.mubr.msk.bf16.gmra.mrb[40].mxu1 %vm214_vm2, %v1144_v26 }
  0x5f   :  { %1056 = vmatprep.mubr.msk.bf16.mxu0 %vm1149_vm0, %v1148_v0  ;;  %1108 = vmatprep.mubr.msk.bf16.mxu1 %vm1149_vm0, %v1148_v0 }
  0x66   :  { %1057 = vmatmul.mubr.msk.bf16.gmra.mrb[44].mxu0 %vm214_vm2, %v1145_v27  ;;  %1109 = vmatmul.mubr.msk.bf16.gmra.mrb[44].mxu1 %vm214_vm2, %v1146_v28 }
  0x67   :  { %1060 = vmatprep.mubr.msk.bf16.mxu0 %vm1149_vm0, %v1148_v0 }
  0x6e   :  { %1061 = vmatmul.mubr.msk.bf16.gmra.mrb[48].mxu0 %vm214_vm2, %v1147_v29 }
  0xe1   :  { %v328_v31 = vpop.f32.mrb[0].mxu0  ;;  %v432_v32 = vpop.f32.mrb[0].mxu1 }
  0xe2   :  { %v329_v33 = vadd.f32 %v1338_v30, %v328_v31  ;;  %v1014_v34 = vpop.f32.mrb[1].mxu0  ;;  %v433_v35 = vadd.f32 %v1338_v30, %v432_v32  ;;  %v1066_v36 = vpop.f32.mrb[1].mxu1 }
  0xe3   :  { %v331_v37 = vpop.f32.mrb[2].mxu0  ;;  %v435_v38 = vpop.f32.mrb[2].mxu1 }
  0xe4   :  { %v526_v39 = vmax.f32 %v329_v33, 0.0  ;;  %v332_v40 = vadd.f32 %v1338_v30, %v331_v37  ;;  %v1015_v41 = vpop.f32.mrb[3].mxu0  ;;  %v552_v42 = vmax.f32 %v433_v35, 0.0  ;;  %v436_v43 = vadd.f32 %v1338_v30, %v435_v38  ;;  %v1067_v44 = vpop.f32.mrb[3].mxu1 }
  0xe6   :  { %v929_v45 = vpack.c.bf16 %v526_v39, %v526_v39  ;;  %v527_v46 = vmax.f32 %v332_v40, 0.0  ;;  %v955_v47 = vpack.c.bf16 %v552_v42, %v552_v42  ;;  %v553_v48 = vmax.f32 %v436_v43, 0.0 }
  0xe8   :  { %773 = vst.msk [vmem:[%s1588_s3] sm:$0xf] %vm772_vm3, %v929_v45  ;;  %v930_v49 = vpack.c.bf16 %v527_v46, %v527_v46  ;;  %799 = vst.msk [vmem:[%s1588_s3 + $0x68] sm:$0xf] %vm772_vm3, %v955_v47  ;;  %v956_v50 = vpack.c.bf16 %v553_v48, %v553_v48 }
  0xe9   :  { %v336_v51 = vpop.f32.mrb[4].mxu0  ;;  %v440_v52 = vpop.f32.mrb[4].mxu1 }
  0xea   :  { %774 = vst.msk [vmem:[%s1588_s3 + $0x4] sm:$0xf] %vm772_vm3, %v930_v49  ;;  %v337_v53 = vadd.f32 %v1338_v30, %v336_v51  ;;  %v1018_v54 = vpop.f32.mrb[5].mxu0  ;;  %800 = vst.msk [vmem:[%s1588_s3 + $0x6c] sm:$0xf] %vm772_vm3, %v956_v50  ;;  %v441_v55 = vadd.f32 %v1338_v30, %v440_v52  ;;  %v1070_v56 = vpop.f32.mrb[5].mxu1 }
  0xeb   :  { %v339_v57 = vpop.f32.mrb[6].mxu0  ;;  %v443_v58 = vpop.f32.mrb[6].mxu1 }
  0xec   :  { %v528_v59 = vmax.f32 %v337_v53, 0.0  ;;  %v340_v60 = vadd.f32 %v1338_v30, %v339_v57  ;;  %v1019_v61 = vpop.f32.mrb[7].mxu0  ;;  %v554_v62 = vmax.f32 %v441_v55, 0.0  ;;  %v444_v63 = vadd.f32 %v1338_v30, %v443_v58  ;;  %v1071_v0 = vpop.f32.mrb[7].mxu1 }
  0xee   :  { %v931_v1 = vpack.c.bf16 %v528_v59, %v528_v59  ;;  %v529_v2 = vmax.f32 %v340_v60, 0.0  ;;  %v957_v3 = vpack.c.bf16 %v554_v62, %v554_v62  ;;  %v555_v4 = vmax.f32 %v444_v63, 0.0 }
  0xf0   :  { %775 = vst.msk [vmem:[%s1588_s3 + $0x8] sm:$0xf] %vm772_vm3, %v931_v1  ;;  %v932_v5 = vpack.c.bf16 %v529_v2, %v529_v2  ;;  %801 = vst.msk [vmem:[%s1588_s3 + $0x70] sm:$0xf] %vm772_vm3, %v957_v3  ;;  %v958_v6 = vpack.c.bf16 %v555_v4, %v555_v4 }
  0xf1   :  { %v344_v7 = vpop.f32.mrb[8].mxu0  ;;  %v448_v8 = vpop.f32.mrb[8].mxu1 }
  0xf2   :  { %776 = vst.msk [vmem:[%s1588_s3 + $0xc] sm:$0xf] %vm772_vm3, %v932_v5  ;;  %v345_v9 = vadd.f32 %v1338_v30, %v344_v7  ;;  %v1022_v10 = vpop.f32.mrb[9].mxu0  ;;  %802 = vst.msk [vmem:[%s1588_s3 + $0x74] sm:$0xf] %vm772_vm3, %v958_v6  ;;  %v449_v11 = vadd.f32 %v1338_v30, %v448_v8  ;;  %v1074_v12 = vpop.f32.mrb[9].mxu1 }
  0xf3   :  { %v347_v13 = vpop.f32.mrb[10].mxu0  ;;  %v451_v14 = vpop.f32.mrb[10].mxu1 }
  0xf4   :  { %v530_v15 = vmax.f32 %v345_v9, 0.0  ;;  %v348_v16 = vadd.f32 %v1338_v30, %v347_v13  ;;  %v1023_v17 = vpop.f32.mrb[11].mxu0  ;;  %v556_v18 = vmax.f32 %v449_v11, 0.0  ;;  %v452_v19 = vadd.f32 %v1338_v30, %v451_v14  ;;  %v1075_v20 = vpop.f32.mrb[11].mxu1 }
  0xf6   :  { %v933_v21 = vpack.c.bf16 %v530_v15, %v530_v15  ;;  %v531_v22 = vmax.f32 %v348_v16, 0.0  ;;  %v959_v23 = vpack.c.bf16 %v556_v18, %v556_v18  ;;  %v557_v24 = vmax.f32 %v452_v19, 0.0 }
  0xf8   :  { %777 = vst.msk [vmem:[%s1588_s3 + $0x10] sm:$0xf] %vm772_vm3, %v933_v21  ;;  %v934_v25 = vpack.c.bf16 %v531_v22, %v531_v22  ;;  %803 = vst.msk [vmem:[%s1588_s3 + $0x78] sm:$0xf] %vm772_vm3, %v959_v23  ;;  %v960_v26 = vpack.c.bf16 %v557_v24, %v557_v24 }
  0xf9   :  { %v352_v27 = vpop.f32.mrb[12].mxu0  ;;  %v456_v28 = vpop.f32.mrb[12].mxu1 }
  0xfa   :  { %778 = vst.msk [vmem:[%s1588_s3 + $0x14] sm:$0xf] %vm772_vm3, %v934_v25  ;;  %v353_v29 = vadd.f32 %v1338_v30, %v352_v27  ;;  %v1026_v31 = vpop.f32.mrb[13].mxu0  ;;  %804 = vst.msk [vmem:[%s1588_s3 + $0x7c] sm:$0xf] %vm772_vm3, %v960_v26  ;;  %v457_v32 = vadd.f32 %v1338_v30, %v456_v28  ;;  %v1078_v33 = vpop.f32.mrb[13].mxu1 }
  0xfb   :  { %v355_v34 = vpop.f32.mrb[14].mxu0  ;;  %v459_v35 = vpop.f32.mrb[14].mxu1 }
  0xfc   :  { %v532_v36 = vmax.f32 %v353_v29, 0.0  ;;  %v356_v37 = vadd.f32 %v1338_v30, %v355_v34  ;;  %v1027_v38 = vpop.f32.mrb[15].mxu0  ;;  %v558_v39 = vmax.f32 %v457_v32, 0.0  ;;  %v460_v40 = vadd.f32 %v1338_v30, %v459_v35  ;;  %v1079_v41 = vpop.f32.mrb[15].mxu1 }
  0xfe   :  { %v935_v42 = vpack.c.bf16 %v532_v36, %v532_v36  ;;  %v533_v43 = vmax.f32 %v356_v37, 0.0  ;;  %v961_v44 = vpack.c.bf16 %v558_v39, %v558_v39  ;;  %v559_v45 = vmax.f32 %v460_v40, 0.0 }
 0x100   :  { %779 = vst.msk [vmem:[%s1588_s3 + $0x18] sm:$0xf] %vm772_vm3, %v935_v42  ;;  %v936_v46 = vpack.c.bf16 %v533_v43, %v533_v43  ;;  %805 = vst.msk [vmem:[%s1588_s3 + $0x80] sm:$0xf] %vm772_vm3, %v961_v44  ;;  %v962_v47 = vpack.c.bf16 %v559_v45, %v559_v45 }
 0x101   :  { %v360_v48 = vpop.f32.mrb[16].mxu0  ;;  %v464_v49 = vpop.f32.mrb[16].mxu1 }
 0x102   :  { %780 = vst.msk [vmem:[%s1588_s3 + $0x1c] sm:$0xf] %vm772_vm3, %v936_v46  ;;  %v361_v50 = vadd.f32 %v1338_v30, %v360_v48  ;;  %v1030_v51 = vpop.f32.mrb[17].mxu0  ;;  %806 = vst.msk [vmem:[%s1588_s3 + $0x84] sm:$0xf] %vm772_vm3, %v962_v47  ;;  %v465_v52 = vadd.f32 %v1338_v30, %v464_v49  ;;  %v1082_v53 = vpop.f32.mrb[17].mxu1 }
 0x103   :  { %v363_v54 = vpop.f32.mrb[18].mxu0  ;;  %v467_v55 = vpop.f32.mrb[18].mxu1 }
 0x104   :  { %v534_v56 = vmax.f32 %v361_v50, 0.0  ;;  %v364_v57 = vadd.f32 %v1338_v30, %v363_v54  ;;  %v1031_v58 = vpop.f32.mrb[19].mxu0  ;;  %v560_v59 = vmax.f32 %v465_v52, 0.0  ;;  %v468_v60 = vadd.f32 %v1338_v30, %v467_v55  ;;  %v1083_v61 = vpop.f32.mrb[19].mxu1 }
 0x106   :  { %v937_v62 = vpack.c.bf16 %v534_v56, %v534_v56  ;;  %v535_v63 = vmax.f32 %v364_v57, 0.0  ;;  %v963_v0 = vpack.c.bf16 %v560_v59, %v560_v59  ;;  %v561_v1 = vmax.f32 %v468_v60, 0.0 }
 0x108   :  { %781 = vst.msk [vmem:[%s1588_s3 + $0x20] sm:$0xf] %vm772_vm3, %v937_v62  ;;  %v938_v2 = vpack.c.bf16 %v535_v63, %v535_v63  ;;  %807 = vst.msk [vmem:[%s1588_s3 + $0x88] sm:$0xf] %vm772_vm3, %v963_v0  ;;  %v964_v3 = vpack.c.bf16 %v561_v1, %v561_v1 }
 0x109   :  { %v368_v4 = vpop.f32.mrb[20].mxu0  ;;  %v472_v5 = vpop.f32.mrb[20].mxu1 }
 0x10a   :  { %782 = vst.msk [vmem:[%s1588_s3 + $0x24] sm:$0xf] %vm772_vm3, %v938_v2  ;;  %v369_v6 = vadd.f32 %v1338_v30, %v368_v4  ;;  %v1034_v7 = vpop.f32.mrb[21].mxu0  ;;  %808 = vst.msk [vmem:[%s1588_s3 + $0x8c] sm:$0xf] %vm772_vm3, %v964_v3  ;;  %v473_v8 = vadd.f32 %v1338_v30, %v472_v5  ;;  %v1086_v9 = vpop.f32.mrb[21].mxu1 }
 0x10b   :  { %v371_v10 = vpop.f32.mrb[22].mxu0  ;;  %v475_v11 = vpop.f32.mrb[22].mxu1 }
 0x10c   :  { %v536_v12 = vmax.f32 %v369_v6, 0.0  ;;  %v372_v13 = vadd.f32 %v1338_v30, %v371_v10  ;;  %v1035_v14 = vpop.f32.mrb[23].mxu0  ;;  %v562_v15 = vmax.f32 %v473_v8, 0.0  ;;  %v476_v16 = vadd.f32 %v1338_v30, %v475_v11  ;;  %v1087_v17 = vpop.f32.mrb[23].mxu1 }
 0x10e   :  { %v939_v18 = vpack.c.bf16 %v536_v12, %v536_v12  ;;  %v537_v19 = vmax.f32 %v372_v13, 0.0  ;;  %v965_v20 = vpack.c.bf16 %v562_v15, %v562_v15  ;;  %v563_v21 = vmax.f32 %v476_v16, 0.0 }
 0x110   :  { %783 = vst.msk [vmem:[%s1588_s3 + $0x28] sm:$0xf] %vm772_vm3, %v939_v18  ;;  %v940_v22 = vpack.c.bf16 %v537_v19, %v537_v19  ;;  %809 = vst.msk [vmem:[%s1588_s3 + $0x90] sm:$0xf] %vm772_vm3, %v965_v20  ;;  %v966_v23 = vpack.c.bf16 %v563_v21, %v563_v21 }
 0x111   :  { %v376_v24 = vpop.f32.mrb[24].mxu0  ;;  %v480_v25 = vpop.f32.mrb[24].mxu1 }
 0x112   :  { %784 = vst.msk [vmem:[%s1588_s3 + $0x2c] sm:$0xf] %vm772_vm3, %v940_v22  ;;  %v377_v26 = vadd.f32 %v1338_v30, %v376_v24  ;;  %v1038_v27 = vpop.f32.mrb[25].mxu0  ;;  %810 = vst.msk [vmem:[%s1588_s3 + $0x94] sm:$0xf] %vm772_vm3, %v966_v23  ;;  %v481_v28 = vadd.f32 %v1338_v30, %v480_v25  ;;  %v1090_v29 = vpop.f32.mrb[25].mxu1 }
 0x113   :  { %v379_v31 = vpop.f32.mrb[26].mxu0  ;;  %v483_v32 = vpop.f32.mrb[26].mxu1 }
 0x114   :  { %v538_v33 = vmax.f32 %v377_v26, 0.0  ;;  %v380_v34 = vadd.f32 %v1338_v30, %v379_v31  ;;  %v1039_v35 = vpop.f32.mrb[27].mxu0  ;;  %v564_v36 = vmax.f32 %v481_v28, 0.0  ;;  %v484_v37 = vadd.f32 %v1338_v30, %v483_v32  ;;  %v1091_v38 = vpop.f32.mrb[27].mxu1 }
 0x116   :  { %v941_v39 = vpack.c.bf16 %v538_v33, %v538_v33  ;;  %v539_v40 = vmax.f32 %v380_v34, 0.0  ;;  %v967_v41 = vpack.c.bf16 %v564_v36, %v564_v36  ;;  %v565_v42 = vmax.f32 %v484_v37, 0.0 }
 0x118   :  { %785 = vst.msk [vmem:[%s1588_s3 + $0x30] sm:$0xf] %vm772_vm3, %v941_v39  ;;  %v942_v43 = vpack.c.bf16 %v539_v40, %v539_v40  ;;  %811 = vst.msk [vmem:[%s1588_s3 + $0x98] sm:$0xf] %vm772_vm3, %v967_v41  ;;  %v968_v44 = vpack.c.bf16 %v565_v42, %v565_v42 }
 0x119   :  { %v384_v45 = vpop.f32.mrb[28].mxu0  ;;  %v488_v46 = vpop.f32.mrb[28].mxu1 }
 0x11a   :  { %786 = vst.msk [vmem:[%s1588_s3 + $0x34] sm:$0xf] %vm772_vm3, %v942_v43  ;;  %v385_v47 = vadd.f32 %v1338_v30, %v384_v45  ;;  %v1042_v48 = vpop.f32.mrb[29].mxu0  ;;  %812 = vst.msk [vmem:[%s1588_s3 + $0x9c] sm:$0xf] %vm772_vm3, %v968_v44  ;;  %v489_v49 = vadd.f32 %v1338_v30, %v488_v46  ;;  %v1094_v50 = vpop.f32.mrb[29].mxu1 }
 0x11b   :  { %v387_v51 = vpop.f32.mrb[30].mxu0  ;;  %v491_v52 = vpop.f32.mrb[30].mxu1 }
 0x11c   :  { %v540_v53 = vmax.f32 %v385_v47, 0.0  ;;  %v388_v54 = vadd.f32 %v1338_v30, %v387_v51  ;;  %v1043_v55 = vpop.f32.mrb[31].mxu0  ;;  %v566_v56 = vmax.f32 %v489_v49, 0.0  ;;  %v492_v57 = vadd.f32 %v1338_v30, %v491_v52  ;;  %v1095_v58 = vpop.f32.mrb[31].mxu1 }
 0x11e   :  { %v943_v59 = vpack.c.bf16 %v540_v53, %v540_v53  ;;  %v541_v60 = vmax.f32 %v388_v54, 0.0  ;;  %v969_v61 = vpack.c.bf16 %v566_v56, %v566_v56  ;;  %v567_v62 = vmax.f32 %v492_v57, 0.0 }
 0x120   :  { %787 = vst.msk [vmem:[%s1588_s3 + $0x38] sm:$0xf] %vm772_vm3, %v943_v59  ;;  %v944_v63 = vpack.c.bf16 %v541_v60, %v541_v60  ;;  %813 = vst.msk [vmem:[%s1588_s3 + $0xa0] sm:$0xf] %vm772_vm3, %v969_v61  ;;  %v970_v0 = vpack.c.bf16 %v567_v62, %v567_v62 }
 0x121   :  { %v392_v1 = vpop.f32.mrb[32].mxu0  ;;  %v496_v2 = vpop.f32.mrb[32].mxu1 }
 0x122   :  { %788 = vst.msk [vmem:[%s1588_s3 + $0x3c] sm:$0xf] %vm772_vm3, %v944_v63  ;;  %v393_v3 = vadd.f32 %v1338_v30, %v392_v1  ;;  %v1046_v4 = vpop.f32.mrb[33].mxu0  ;;  %814 = vst.msk [vmem:[%s1588_s3 + $0xa4] sm:$0xf] %vm772_vm3, %v970_v0  ;;  %v497_v5 = vadd.f32 %v1338_v30, %v496_v2  ;;  %v1098_v6 = vpop.f32.mrb[33].mxu1 }
 0x123   :  { %v395_v7 = vpop.f32.mrb[34].mxu0  ;;  %v499_v8 = vpop.f32.mrb[34].mxu1 }
 0x124   :  { %v542_v9 = vmax.f32 %v393_v3, 0.0  ;;  %v396_v10 = vadd.f32 %v1338_v30, %v395_v7  ;;  %v1047_v11 = vpop.f32.mrb[35].mxu0  ;;  %v568_v12 = vmax.f32 %v497_v5, 0.0  ;;  %v500_v13 = vadd.f32 %v1338_v30, %v499_v8  ;;  %v1099_v14 = vpop.f32.mrb[35].mxu1 }
 0x126   :  { %v945_v15 = vpack.c.bf16 %v542_v9, %v542_v9  ;;  %v543_v16 = vmax.f32 %v396_v10, 0.0  ;;  %v971_v17 = vpack.c.bf16 %v568_v12, %v568_v12  ;;  %v569_v18 = vmax.f32 %v500_v13, 0.0 }
 0x128   :  { %789 = vst.msk [vmem:[%s1588_s3 + $0x40] sm:$0xf] %vm772_vm3, %v945_v15  ;;  %v946_v19 = vpack.c.bf16 %v543_v16, %v543_v16  ;;  %815 = vst.msk [vmem:[%s1588_s3 + $0xa8] sm:$0xf] %vm772_vm3, %v971_v17  ;;  %v972_v20 = vpack.c.bf16 %v569_v18, %v569_v18 }
 0x129   :  { %v400_v21 = vpop.f32.mrb[36].mxu0  ;;  %v504_v22 = vpop.f32.mrb[36].mxu1 }
 0x12a   :  { %790 = vst.msk [vmem:[%s1588_s3 + $0x44] sm:$0xf] %vm772_vm3, %v946_v19  ;;  %v401_v23 = vadd.f32 %v1338_v30, %v400_v21  ;;  %v1050_v24 = vpop.f32.mrb[37].mxu0  ;;  %816 = vst.msk [vmem:[%s1588_s3 + $0xac] sm:$0xf] %vm772_vm3, %v972_v20  ;;  %v505_v25 = vadd.f32 %v1338_v30, %v504_v22  ;;  %v1102_v26 = vpop.f32.mrb[37].mxu1 }
 0x12b   :  { %v403_v27 = vpop.f32.mrb[38].mxu0  ;;  %v507_v28 = vpop.f32.mrb[38].mxu1 }
 0x12c   :  { %v544_v29 = vmax.f32 %v401_v23, 0.0  ;;  %v404_v31 = vadd.f32 %v1338_v30, %v403_v27  ;;  %v1051_v32 = vpop.f32.mrb[39].mxu0  ;;  %v570_v33 = vmax.f32 %v505_v25, 0.0  ;;  %v508_v34 = vadd.f32 %v1338_v30, %v507_v28  ;;  %v1103_v35 = vpop.f32.mrb[39].mxu1 }
 0x12e   :  { %v947_v36 = vpack.c.bf16 %v544_v29, %v544_v29  ;;  %v545_v37 = vmax.f32 %v404_v31, 0.0  ;;  %v973_v38 = vpack.c.bf16 %v570_v33, %v570_v33  ;;  %v571_v39 = vmax.f32 %v508_v34, 0.0 }
 0x130   :  { %791 = vst.msk [vmem:[%s1588_s3 + $0x48] sm:$0xf] %vm772_vm3, %v947_v36  ;;  %v948_v40 = vpack.c.bf16 %v545_v37, %v545_v37  ;;  %817 = vst.msk [vmem:[%s1588_s3 + $0xb0] sm:$0xf] %vm772_vm3, %v973_v38  ;;  %v974_v41 = vpack.c.bf16 %v571_v39, %v571_v39 }
 0x131   :  { %v408_v42 = vpop.f32.mrb[40].mxu0  ;;  %v512_v43 = vpop.f32.mrb[40].mxu1 }
 0x132   :  { %792 = vst.msk [vmem:[%s1588_s3 + $0x4c] sm:$0xf] %vm772_vm3, %v948_v40  ;;  %v409_v44 = vadd.f32 %v1338_v30, %v408_v42  ;;  %v1054_v45 = vpop.f32.mrb[41].mxu0  ;;  %818 = vst.msk [vmem:[%s1588_s3 + $0xb4] sm:$0xf] %vm772_vm3, %v974_v41  ;;  %v513_v46 = vadd.f32 %v1338_v30, %v512_v43  ;;  %v1106_v47 = vpop.f32.mrb[41].mxu1 }
 0x133   :  { %v411_v48 = vpop.f32.mrb[42].mxu0  ;;  %v515_v49 = vpop.f32.mrb[42].mxu1 }
 0x134   :  { %v546_v50 = vmax.f32 %v409_v44, 0.0  ;;  %v412_v51 = vadd.f32 %v1338_v30, %v411_v48  ;;  %v1055_v52 = vpop.f32.mrb[43].mxu0  ;;  %v572_v53 = vmax.f32 %v513_v46, 0.0  ;;  %v516_v54 = vadd.f32 %v1338_v30, %v515_v49  ;;  %v1107_v55 = vpop.f32.mrb[43].mxu1 }
 0x136   :  { %v949_v56 = vpack.c.bf16 %v546_v50, %v546_v50  ;;  %v547_v57 = vmax.f32 %v412_v51, 0.0  ;;  %v975_v58 = vpack.c.bf16 %v572_v53, %v572_v53  ;;  %v573_v59 = vmax.f32 %v516_v54, 0.0 }
 0x138   :  { %793 = vst.msk [vmem:[%s1588_s3 + $0x50] sm:$0xf] %vm772_vm3, %v949_v56  ;;  %v950_v60 = vpack.c.bf16 %v547_v57, %v547_v57  ;;  %819 = vst.msk [vmem:[%s1588_s3 + $0xb8] sm:$0xf] %vm772_vm3, %v975_v58  ;;  %v976_v61 = vpack.c.bf16 %v573_v59, %v573_v59 }
 0x139   :  { %v416_v62 = vpop.f32.mrb[44].mxu0  ;;  %v520_v63 = vpop.f32.mrb[44].mxu1 }
 0x13a   :  { %794 = vst.msk [vmem:[%s1588_s3 + $0x54] sm:$0xf] %vm772_vm3, %v950_v60  ;;  %v417_v0 = vadd.f32 %v1338_v30, %v416_v62  ;;  %v1058_v1 = vpop.f32.mrb[45].mxu0  ;;  %820 = vst.msk [vmem:[%s1588_s3 + $0xbc] sm:$0xf] %vm772_vm3, %v976_v61  ;;  %v521_v2 = vadd.f32 %v1338_v30, %v520_v63  ;;  %v1110_v3 = vpop.f32.mrb[45].mxu1 }
 0x13b   :  { %v419_v4 = vpop.f32.mrb[46].mxu0  ;;  %v523_v5 = vpop.f32.mrb[46].mxu1 }
 0x13c   :  { %v548_v6 = vmax.f32 %v417_v0, 0.0  ;;  %v420_v7 = vadd.f32 %v1338_v30, %v419_v4  ;;  %v1059_v8 = vpop.f32.mrb[47].mxu0  ;;  %v574_v9 = vmax.f32 %v521_v2, 0.0  ;;  %v1111_v10 = vpop.f32.mrb[47].mxu1 }
 0x13e   :  { %v951_v11 = vpack.c.bf16 %v548_v6, %v548_v6  ;;  %v549_v12 = vmax.f32 %v420_v7, 0.0  ;;  %v977_v13 = vpack.c.bf16 %v574_v9, %v574_v9 }
 0x140   :  { %795 = vst.msk [vmem:[%s1588_s3 + $0x58] sm:$0xf] %vm772_vm3, %v951_v11  ;;  %v952_v14 = vpack.c.bf16 %v549_v12, %v549_v12  ;;  %821 = vst.msk [vmem:[%s1588_s3 + $0xc0] sm:$0xf] %vm772_vm3, %v977_v13 }
 0x141   :  { %v424_v15 = vpop.f32.mrb[48].mxu0 }
 0x142   :  { %796 = vst.msk [vmem:[%s1588_s3 + $0x5c] sm:$0xf] %vm772_vm3, %v952_v14  ;;  %v425_v16 = vadd.f32 %v1338_v30, %v424_v15  ;;  %v1062_v17 = vpop.f32.mrb[49].mxu0 }
 0x143   :  { %v427_v18 = vpop.f32.mrb[50].mxu0 }
 0x144   :  { %v550_v19 = vmax.f32 %v425_v16, 0.0  ;;  %v428_v20 = vadd.f32 %v1338_v30, %v427_v18  ;;  %v1063_v21 = vpop.f32.mrb[51].mxu0 }
 0x146   :  { %v953_v22 = vpack.c.bf16 %v550_v19, %v550_v19  ;;  %v551_v23 = vmax.f32 %v428_v20, 0.0 }
 0x148   :  { %797 = vst.msk [vmem:[%s1588_s3 + $0x60] sm:$0xf] %vm772_vm3, %v953_v22  ;;  %v954_v24 = vpack.c.bf16 %v551_v23, %v551_v23 }
 0x14a   :  { %798 = vst.msk [vmem:[%s1588_s3 + $0x64] sm:$0xf] %vm772_vm3, %v954_v24 }

// kernel: encoder_block_forward.3
= control target key start
LH: loop header
LB: loop body
LE: loop exit
PB: predicated region body
PF: predicated region fallthrough
CT: control target
= control target key end

     0   :  { %v1484_v0 = vmov 0   ;;  %vm508_vm0 = vcmask 261120   ;;  %vm1097_vm1 = vcmask 257024   ;;  %s1992_s1 = inlined_call_operand.vmem [shape: bf16[288,32], index: 1, kind: input, shape index: {}]   ;;  %s1993_s0 = inlined_call_operand.vmem [shape: bf16[288,288], index: 0, kind: input, shape index: {}]   ;;  %s1994_s2 = inlined_call_operand.vmem [shape: f32[1,32], index: 2, kind: input, shape index: {}]   ;;  %s1995_s3 = inlined_call_operand.vmem [shape: bf16[288,32], index: 3, kind: output, shape index: {}]  }
   0x1   :  { %563 = vmatprep.subr.bf16.mxu0 %v1484_v0  ;;  %1361 = vmatprep.subr.bf16.mxu1 %v1484_v0  ;;  %v1394_v1 = vld [vmem:[%s1992_s1] sm:$0xff]   ;;  %v1395_v2 = vld [vmem:[%s1992_s1 + $0x8] sm:$0xff]   ;;  %v1396_v3 = vld [vmem:[%s1992_s1 + $0x10] sm:$0xff]  }
   0x2   :  { %564 = vmatpush1.bf16.msra.mxu0 %v1394_v1  ;;  %1377 = vmatpush1.bf16.msra.mxu1 %v1394_v1  ;;  %v1397_v4 = vld [vmem:[%s1992_s1 + $0x18] sm:$0xff]   ;;  %v1398_v5 = vld [vmem:[%s1992_s1 + $0x20] sm:$0xff]   ;;  %v1399_v7 = vld [vmem:[%s1992_s1 + $0x28] sm:$0xff]  }
   0x3   :  { %565 = vmatprep.subr.bf16.mxu0 %v1484_v0  ;;  %1362 = vmatprep.subr.bf16.mxu1 %v1484_v0  ;;  %v1412_v6 = vld [vmem:[%s1993_s0 + $0x4] ss:$12 sps:$4 sm:$0xff]   ;;  %v1415_v8 = vld [vmem:[%s1993_s0 + $0x154] ss:$12 sps:$4 sm:$0xff]   ;;  %v1401_v10 = vld [vmem:[%s1992_s1 + $0x38] sm:$0xff]  }
   0x4   :  { %595 = vmatprep.mubr.bf16.mxu0 %v1412_v6  ;;  %707 = vmatprep.mubr.bf16.mxu1 %v1415_v8  ;;  %v1400_v9 = vld [vmem:[%s1992_s1 + $0x30] sm:$0xff]   ;;  %v1402_v11 = vld [vmem:[%s1992_s1 + $0x40] sm:$0xff]   ;;  %v1403_v12 = vld [vmem:[%s1992_s1 + $0x48] sm:$0xff]  }
   0x5   :  { %v1404_v13 = vld [vmem:[%s1992_s1 + $0x50] sm:$0xff]   ;;  %v1405_v14 = vld [vmem:[%s1992_s1 + $0x58] sm:$0xff]   ;;  %v1406_v15 = vld [vmem:[%s1992_s1 + $0x60] sm:$0xff]  }
   0x6   :  { %566 = vmatpush1.bf16.msra.mxu0 %v1395_v2  ;;  %1378 = vmatpush1.bf16.msra.mxu1 %v1395_v2  ;;  %v1407_v16 = vld [vmem:[%s1992_s1 + $0x68] sm:$0xff]   ;;  %v1408_v17 = vld [vmem:[%s1992_s1 + $0x70] sm:$0xff]   ;;  %v1409_v18 = vld [vmem:[%s1992_s1 + $0x78] sm:$0xff]  }
   0x7   :  { %567 = vmatprep.subr.bf16.mxu0 %v1484_v0  ;;  %1363 = vmatprep.subr.bf16.mxu1 %v1484_v0  ;;  %v1422_v19 = vld [vmem:[%s1992_s1 + $0x80] sm:$0xff]   ;;  %v1413_v21 = vld [vmem:[%s1993_s0 + $0x150] ss:$12 sps:$4 sm:$0xff]   ;;  %v1418_v23 = vld [vmem:[%s1993_s0 + $0x16c] ss:$12 sps:$4 sm:$0xff]  }
   0x8   :  { %v1410_v20 = vld [vmem:[%s1993_s0] ss:$12 sps:$4 sm:$0xff]   ;;  %v1416_v22 = vld [vmem:[%s1993_s0 + $0x1c] ss:$12 sps:$4 sm:$0xff]   ;;  %v1420_v25 = vld [vmem:[%s1993_s0 + $0x18] ss:$12 sps:$4 sm:$0xff]  }
   0x9   :  { %v1435_v24 = vld [vmem:[%s1992_s1 + $0x88] sm:$0xff]   ;;  %v1423_v27 = vld [vmem:[%s1993_s0 + $0x34] ss:$12 sps:$4 sm:$0xff]   ;;  %v1425_v28 = vld [vmem:[%s1993_s0 + $0x184] ss:$12 sps:$4 sm:$0xff]  }
   0xa   :  { %568 = vmatpush1.bf16.msra.mxu0 %v1396_v3  ;;  %1379 = vmatpush1.bf16.msra.mxu1 %v1396_v3  ;;  %v1421_v26 = vld [vmem:[%s1993_s0 + $0x168] ss:$12 sps:$4 sm:$0xff]   ;;  %v1427_v29 = vld [vmem:[%s1993_s0 + $0x30] ss:$12 sps:$4 sm:$0xff]   ;;  %v1428_v30 = vld [vmem:[%s1993_s0 + $0x180] ss:$12 sps:$4 sm:$0xff]  }
   0xb   :  { %569 = vmatprep.subr.bf16.mxu0 %v1484_v0  ;;  %1364 = vmatprep.subr.bf16.mxu1 %v1484_v0  ;;  %v1429_v31 = vld [vmem:[%s1993_s0 + $0x4c] ss:$12 sps:$4 sm:$0xff]   ;;  %v1431_v32 = vld [vmem:[%s1993_s0 + $0x19c] ss:$12 sps:$4 sm:$0xff]   ;;  %v1436_v35 = vld [vmem:[%s1993_s0 + $0x64] ss:$12 sps:$4 sm:$0xff]  }
   0xc   :  { %v1433_v33 = vld [vmem:[%s1993_s0 + $0x48] ss:$12 sps:$4 sm:$0xff]   ;;  %v1434_v34 = vld [vmem:[%s1993_s0 + $0x198] ss:$12 sps:$4 sm:$0xff]   ;;  %v1439_v37 = vld [vmem:[%s1993_s0 + $0x60] ss:$12 sps:$4 sm:$0xff]  }
   0xd   :  { %v1438_v36 = vld [vmem:[%s1993_s0 + $0x8] ss:$12 sps:$4 sm:$0xff]   ;;  %v1440_v38 = vld [vmem:[%s1993_s0 + $0x20] ss:$12 sps:$4 sm:$0xff]   ;;  %v1443_v40 = vld [vmem:[%s1993_s0 + $0x38] ss:$12 sps:$4 sm:$0xff]  }
   0xe   :  { %570 = vmatpush1.bf16.msra.mxu0 %v1397_v4  ;;  %1380 = vmatpush1.bf16.msra.mxu1 %v1397_v4  ;;  %v1441_v39 = vld [vmem:[%s1993_s0 + $0x7c] ss:$12 sps:$4 sm:$0xff]   ;;  %v1444_v41 = vld [vmem:[%s1993_s0 + $0x78] ss:$12 sps:$4 sm:$0xff]   ;;  %v1446_v43 = vld [vmem:[%s1993_s0 + $0x94] ss:$12 sps:$4 sm:$0xff]  }
   0xf   :  { %571 = vmatprep.subr.bf16.mxu0 %v1484_v0  ;;  %1365 = vmatprep.subr.bf16.mxu1 %v1484_v0  ;;  %v1445_v42 = vld [vmem:[%s1993_s0 + $0x50] ss:$12 sps:$4 sm:$0xff]   ;;  %v1448_v44 = vld [vmem:[%s1993_s0 + $0x68] ss:$12 sps:$4 sm:$0xff]   ;;  %v1450_v46 = vld [vmem:[%s1993_s0 + $0x80] ss:$12 sps:$4 sm:$0xff]  }
  0x10   :  { %v1449_v45 = vld [vmem:[%s1993_s0 + $0x90] ss:$12 sps:$4 sm:$0xff]   ;;  %v1451_v47 = vld [vmem:[%s1993_s0 + $0xac] ss:$12 sps:$4 sm:$0xff]   ;;  %v1454_v49 = vld [vmem:[%s1993_s0 + $0xa8] ss:$12 sps:$4 sm:$0xff]  }
  0x11   :  { %v1453_v48 = vld [vmem:[%s1993_s0 + $0x98] ss:$12 sps:$4 sm:$0xff]   ;;  %v1455_v50 = vld [vmem:[%s1993_s0 + $0xb0] ss:$12 sps:$4 sm:$0xff]   ;;  %v1458_v52 = vld [vmem:[%s1993_s0 + $0xc8] ss:$12 sps:$4 sm:$0xff]  }
  0x12   :  { %572 = vmatpush1.bf16.msra.mxu0 %v1398_v5  ;;  %1381 = vmatpush1.bf16.msra.mxu1 %v1398_v5  ;;  %v1456_v51 = vld [vmem:[%s1993_s0 + $0xc4] ss:$12 sps:$4 sm:$0xff]   ;;  %v1459_v53 = vld [vmem:[%s1993_s0 + $0xc0] ss:$12 sps:$4 sm:$0xff]   ;;  %v1461_v55 = vld [vmem:[%s1993_s0 + $0xdc] ss:$12 sps:$4 sm:$0xff]  }
  0x13   :  { %573 = vmatprep.subr.bf16.mxu0 %v1484_v0  ;;  %1366 = vmatprep.subr.bf16.mxu1 %v1484_v0  ;;  %v1460_v54 = vld [vmem:[%s1993_s0 + $0xe0] ss:$12 sps:$4 sm:$0xff]   ;;  %v1463_v56 = vld [vmem:[%s1993_s0 + $0xf8] ss:$12 sps:$4 sm:$0xff]   ;;  %v1465_v58 = vld [vmem:[%s1993_s0 + $0x110] ss:$12 sps:$4 sm:$0xff]  }
  0x14   :  { %v1464_v57 = vld [vmem:[%s1993_s0 + $0xd8] ss:$12 sps:$4 sm:$0xff]   ;;  %v1466_v59 = vld [vmem:[%s1993_s0 + $0xf4] ss:$12 sps:$4 sm:$0xff]   ;;  %v1469_v61 = vld [vmem:[%s1993_s0 + $0xf0] ss:$12 sps:$4 sm:$0xff]  }
  0x15   :  { %v1468_v60 = vld [vmem:[%s1993_s0 + $0x128] ss:$12 sps:$4 sm:$0xff]   ;;  %v1470_v62 = vld [vmem:[%s1993_s0 + $0x140] ss:$12 sps:$4 sm:$0xff]   ;;  %v1475_v2 = vld [vmem:[%s1993_s0 + $0x170] ss:$12 sps:$4 sm:$0xff]  }
  0x16   :  { %574 = vmatpush1.bf16.msra.mxu0 %v1399_v7  ;;  %1382 = vmatpush1.bf16.msra.mxu1 %v1399_v7  ;;  %v1471_v63 = vld [vmem:[%s1993_s0 + $0x10c] ss:$12 sps:$4 sm:$0xff]   ;;  %v1474_v1 = vld [vmem:[%s1993_s0 + $0x108] ss:$12 sps:$4 sm:$0xff]   ;;  %v1476_v3 = vld [vmem:[%s1993_s0 + $0x124] ss:$12 sps:$4 sm:$0xff]  }
  0x17   :  { %575 = vmatprep.subr.bf16.mxu0 %v1484_v0  ;;  %1367 = vmatprep.subr.bf16.mxu1 %v1484_v0  ;;  %v1478_v4 = vld [vmem:[%s1993_s0 + $0x188] ss:$12 sps:$4 sm:$0xff]   ;;  %v1479_v5 = vld [vmem:[%s1993_s0 + $0x120] ss:$12 sps:$4 sm:$0xff]   ;;  %v1483_v8 = vld [vmem:[%s1993_s0 + $0x138] ss:$12 sps:$4 sm:$0xff]  }
  0x18   :  { %v1480_v6 = vld [vmem:[%s1993_s0 + $0x1a0] ss:$12 sps:$4 sm:$0xff]   ;;  %v1481_v7 = vld [vmem:[%s1993_s0 + $0x13c] ss:$12 sps:$4 sm:$0xff]  }
  0x1a   :  { %576 = vmatpush1.bf16.msra.mxu0 %v1400_v9  ;;  %1383 = vmatpush1.bf16.msra.mxu1 %v1400_v9 }
  0x1b   :  { %577 = vmatprep.subr.bf16.mxu0 %v1484_v0  ;;  %1368 = vmatprep.subr.bf16.mxu1 %v1484_v0 }
  0x1e   :  { %578 = vmatpush1.bf16.msra.mxu0 %v1401_v10  ;;  %1384 = vmatpush1.bf16.msra.mxu1 %v1401_v10 }
  0x1f   :  { %579 = vmatprep.subr.bf16.mxu0 %v1484_v0  ;;  %1369 = vmatprep.subr.bf16.mxu1 %v1484_v0 }
  0x22   :  { %580 = vmatpush1.bf16.msra.mxu0 %v1402_v11  ;;  %1385 = vmatpush1.bf16.msra.mxu1 %v1402_v11 }
  0x23   :  { %581 = vmatprep.subr.bf16.mxu0 %v1484_v0  ;;  %1370 = vmatprep.subr.bf16.mxu1 %v1484_v0 }
  0x26   :  { %582 = vmatpush1.bf16.msra.mxu0 %v1403_v12  ;;  %1386 = vmatpush1.bf16.msra.mxu1 %v1403_v12 }
  0x27   :  { %583 = vmatprep.subr.bf16.mxu0 %v1484_v0  ;;  %1371 = vmatprep.subr.bf16.mxu1 %v1484_v0 }
  0x2a   :  { %584 = vmatpush1.bf16.msra.mxu0 %v1404_v13  ;;  %1387 = vmatpush1.bf16.msra.mxu1 %v1404_v13 }
  0x2b   :  { %585 = vmatprep.subr.bf16.mxu0 %v1484_v0  ;;  %1372 = vmatprep.subr.bf16.mxu1 %v1484_v0 }
  0x2e   :  { %586 = vmatpush1.bf16.msra.mxu0 %v1405_v14  ;;  %1388 = vmatpush1.bf16.msra.mxu1 %v1405_v14 }
  0x2f   :  { %587 = vmatprep.subr.bf16.mxu0 %v1484_v0  ;;  %1373 = vmatprep.subr.bf16.mxu1 %v1484_v0 }
  0x32   :  { %588 = vmatpush1.bf16.msra.mxu0 %v1406_v15  ;;  %1389 = vmatpush1.bf16.msra.mxu1 %v1406_v15 }
  0x33   :  { %589 = vmatprep.subr.bf16.mxu0 %v1484_v0  ;;  %1374 = vmatprep.subr.bf16.mxu1 %v1484_v0 }
  0x36   :  { %590 = vmatpush1.bf16.msra.mxu0 %v1407_v16  ;;  %1390 = vmatpush1.bf16.msra.mxu1 %v1407_v16 }
  0x37   :  { %591 = vmatprep.subr.bf16.mxu0 %v1484_v0  ;;  %1375 = vmatprep.subr.bf16.mxu1 %v1484_v0 }
  0x3a   :  { %592 = vmatpush1.bf16.msra.mxu0 %v1408_v17  ;;  %1391 = vmatpush1.bf16.msra.mxu1 %v1408_v17 }
  0x3b   :  { %593 = vmatprep.subr.bf16.mxu0 %v1484_v0  ;;  %1376 = vmatprep.subr.bf16.mxu1 %v1484_v0  ;;  %v1473_v0 = vld [vmem:[%s1993_s0 + $0x158] ss:$12 sps:$4 sm:$0xff]  }
  0x3e   :  { %594 = vmatpush1.bf16.msra.mxu0 %v1409_v18  ;;  %1392 = vmatpush1.bf16.msra.mxu1 %v1409_v18 }
  0x3f   :  { %1321 = vmatprep.subr.bf16.mxu1 %v1422_v19 }
  0x41   :  { %596 = vmatmul.mubr.bf16.vlgmr.msra.gmra.mrb[0].mxu0 %v1410_v20  ;;  %708 = vmatmul.mubr.bf16.vlgmr.msra.gmra.mrb[0].mxu1 %v1413_v21 }
  0x42   :  { %603 = vmatprep.mubr.bf16.mxu0 %v1416_v22  ;;  %715 = vmatprep.mubr.bf16.mxu1 %v1418_v23 }
  0x43   :  { %1322 = vmatpush3.bf16.msra.mxu1 %v1422_v19 }
  0x44   :  { %1323 = vmatprep.subr.bf16.mxu1 %v1435_v24 }
  0x47   :  { %1324 = vmatpush3.bf16.msra.mxu1 %v1435_v24 }
  0x49   :  { %604 = vmatmul.mubr.bf16.gmra.mrb[4].mxu0 %v1420_v25  ;;  %716 = vmatmul.mubr.bf16.gmra.mrb[4].mxu1 %v1421_v26 }
  0x4a   :  { %611 = vmatprep.mubr.bf16.mxu0 %v1423_v27  ;;  %723 = vmatprep.mubr.bf16.mxu1 %v1425_v28 }
  0x51   :  { %612 = vmatmul.mubr.bf16.gmra.mrb[8].mxu0 %v1427_v29  ;;  %724 = vmatmul.mubr.bf16.gmra.mrb[8].mxu1 %v1428_v30 }
  0x52   :  { %619 = vmatprep.mubr.bf16.mxu0 %v1429_v31  ;;  %731 = vmatprep.mubr.bf16.mxu1 %v1431_v32 }
  0x59   :  { %620 = vmatmul.mubr.bf16.gmra.mrb[12].mxu0 %v1433_v33  ;;  %732 = vmatmul.mubr.bf16.gmra.mrb[12].mxu1 %v1434_v34 }
  0x5a   :  { %627 = vmatprep.mubr.bf16.mxu0 %v1436_v35  ;;  %1325 = vmatprep.mubr.msk.bf16.mxu1 %vm508_vm0, %v1438_v36 }
  0x61   :  { %628 = vmatmul.mubr.bf16.gmra.mrb[16].mxu0 %v1439_v37  ;;  %1326 = vmatmul.mubr.msk.bf16.vlgmr.msra.gmra.mrb[16].mxu1 %vm508_vm0, %v1440_v38 }
  0x62   :  { %635 = vmatprep.mubr.bf16.mxu0 %v1441_v39  ;;  %1329 = vmatprep.mubr.msk.bf16.mxu1 %vm508_vm0, %v1443_v40 }
  0x69   :  { %636 = vmatmul.mubr.bf16.gmra.mrb[20].mxu0 %v1444_v41  ;;  %1330 = vmatmul.mubr.msk.bf16.gmra.mrb[20].mxu1 %vm508_vm0, %v1445_v42  ;;  %v1790_v41 = vld [vmem:[%s1994_s2] ss:$0 sm:$0xff] }
  0x6a   :  { %643 = vmatprep.mubr.bf16.mxu0 %v1446_v43  ;;  %1333 = vmatprep.mubr.msk.bf16.mxu1 %vm508_vm0, %v1448_v44 }
  0x71   :  { %644 = vmatmul.mubr.bf16.gmra.mrb[24].mxu0 %v1449_v45  ;;  %1334 = vmatmul.mubr.msk.bf16.gmra.mrb[24].mxu1 %vm508_vm0, %v1450_v46 }
  0x72   :  { %651 = vmatprep.mubr.bf16.mxu0 %v1451_v47  ;;  %1337 = vmatprep.mubr.msk.bf16.mxu1 %vm508_vm0, %v1453_v48 }
  0x79   :  { %652 = vmatmul.mubr.bf16.gmra.mrb[28].mxu0 %v1454_v49  ;;  %1338 = vmatmul.mubr.msk.bf16.gmra.mrb[28].mxu1 %vm508_vm0, %v1455_v50 }
  0x7a   :  { %659 = vmatprep.mubr.bf16.mxu0 %v1456_v51  ;;  %1341 = vmatprep.mubr.msk.bf16.mxu1 %vm508_vm0, %v1458_v52 }
  0x81   :  { %660 = vmatmul.mubr.bf16.gmra.mrb[32].mxu0 %v1459_v53  ;;  %1342 = vmatmul.mubr.msk.bf16.gmra.mrb[32].mxu1 %vm508_vm0, %v1460_v54 }
  0x82   :  { %667 = vmatprep.mubr.bf16.mxu0 %v1461_v55  ;;  %1345 = vmatprep.mubr.msk.bf16.mxu1 %vm508_vm0, %v1463_v56 }
  0x89   :  { %668 = vmatmul.mubr.bf16.gmra.mrb[36].mxu0 %v1464_v57  ;;  %1346 = vmatmul.mubr.msk.bf16.gmra.mrb[36].mxu1 %vm508_vm0, %v1465_v58 }
  0x8a   :  { %675 = vmatprep.mubr.bf16.mxu0 %v1466_v59  ;;  %1349 = vmatprep.mubr.msk.bf16.mxu1 %vm508_vm0, %v1468_v60 }
  0x91   :  { %676 = vmatmul.mubr.bf16.gmra.mrb[40].mxu0 %v1469_v61  ;;  %1350 = vmatmul.mubr.msk.bf16.gmra.mrb[40].mxu1 %vm508_vm0, %v1470_v62 }
  0x92   :  { %683 = vmatprep.mubr.bf16.mxu0 %v1471_v63  ;;  %1353 = vmatprep.mubr.msk.bf16.mxu1 %vm508_vm0, %v1473_v0 }
  0x99   :  { %684 = vmatmul.mubr.bf16.gmra.mrb[44].mxu0 %v1474_v1  ;;  %1354 = vmatmul.mubr.msk.bf16.gmra.mrb[44].mxu1 %vm508_vm0, %v1475_v2 }
  0x9a   :  { %691 = vmatprep.mubr.bf16.mxu0 %v1476_v3  ;;  %1357 = vmatprep.mubr.msk.bf16.mxu1 %vm508_vm0, %v1478_v4 }
  0xa1   :  { %692 = vmatmul.mubr.bf16.gmra.mrb[48].mxu0 %v1479_v5  ;;  %1358 = vmatmul.mubr.msk.bf16.gmra.mrb[48].mxu1 %vm508_vm0, %v1480_v6 }
  0xa2   :  { %699 = vmatprep.mubr.bf16.mxu0 %v1481_v7 }
  0xa9   :  { %700 = vmatmul.mubr.bf16.gmra.mrb[52].mxu0 %v1483_v8 }
 0x114   :  { %v597_v9 = vpop.f32.mrb[0].mxu0  ;;  %v1771_v10 = vpop.f32.mrb[0].mxu1 }
 0x115   :  { %v599_v11 = vpop.f32.mrb[1].mxu0  ;;  %v711_v12 = vpop.f32.mrb[1].mxu1  ;;  %v598_v43 = vadd.f32 %v1790_v41, %v597_v9 }
 0x116   :  { %v600_v13 = vpop.f32.mrb[2].mxu0  ;;  %v1773_v14 = vpop.f32.mrb[2].mxu1 }
 0x117   :  { %v602_v15 = vpop.f32.mrb[3].mxu0  ;;  %v714_v16 = vpop.f32.mrb[3].mxu1  ;;  %v601_v50 = vadd.f32 %v1790_v41, %v600_v13 }
 0x11c   :  { %v605_v17 = vpop.f32.mrb[4].mxu0  ;;  %v1775_v18 = vpop.f32.mrb[4].mxu1 }
 0x11d   :  { %v607_v19 = vpop.f32.mrb[5].mxu0  ;;  %v719_v20 = vpop.f32.mrb[5].mxu1  ;;  %v606_v42 = vadd.f32 %v1790_v41, %v605_v17 }
 0x11e   :  { %v608_v21 = vpop.f32.mrb[6].mxu0  ;;  %v1777_v22 = vpop.f32.mrb[6].mxu1 }
 0x11f   :  { %v610_v23 = vpop.f32.mrb[7].mxu0  ;;  %v722_v24 = vpop.f32.mrb[7].mxu1  ;;  %v609_v46 = vadd.f32 %v1790_v41, %v608_v21 }
 0x124   :  { %v613_v25 = vpop.f32.mrb[8].mxu0  ;;  %v1779_v26 = vpop.f32.mrb[8].mxu1 }
 0x125   :  { %v615_v27 = vpop.f32.mrb[9].mxu0  ;;  %v727_v28 = vpop.f32.mrb[9].mxu1  ;;  %v614_v2 = vadd.f32 %v1790_v41, %v613_v25 }
 0x126   :  { %v616_v29 = vpop.f32.mrb[10].mxu0  ;;  %v1781_v30 = vpop.f32.mrb[10].mxu1 }
 0x127   :  { %v618_v31 = vpop.f32.mrb[11].mxu0  ;;  %v730_v32 = vpop.f32.mrb[11].mxu1  ;;  %v617_v11 = vadd.f32 %v1790_v41, %v616_v29 }
 0x12c   :  { %v621_v33 = vpop.f32.mrb[12].mxu0  ;;  %v1783_v34 = vpop.f32.mrb[12].mxu1 }
 0x12d   :  { %v623_v35 = vpop.f32.mrb[13].mxu0  ;;  %v735_v36 = vpop.f32.mrb[13].mxu1  ;;  %v622_v0 = vadd.f32 %v1790_v41, %v621_v33 }
 0x12e   :  { %v624_v37 = vpop.f32.mrb[14].mxu0  ;;  %v1785_v38 = vpop.f32.mrb[14].mxu1 }
 0x12f   :  { %v626_v39 = vpop.f32.mrb[15].mxu0  ;;  %v738_v40 = vpop.f32.mrb[15].mxu1  ;;  %v625_v6 = vadd.f32 %v1790_v41, %v624_v37 }
 0x134   :  { %v629_v44 = vpop.f32.mrb[16].mxu0  ;;  %v1327_v45 = vpop.f32.mrb[16].mxu1 }
 0x135   :  { %v783_v47 = vadd.f32 %v1327_v45, %v606_v42  ;;  %v631_v48 = vpop.f32.mrb[17].mxu0  ;;  %v774_v49 = vpop.f32.mrb[17].mxu1  ;;  %v630_v32 = vadd.f32 %v1790_v41, %v629_v44 }
 0x136   :  { %v775_v51 = vadd.f32 %v774_v49, %v598_v43  ;;  %v632_v52 = vpop.f32.mrb[18].mxu0  ;;  %v1328_v53 = vpop.f32.mrb[18].mxu1 }
 0x137   :  { %v919_v54 = vmax.f32 %v783_v47, 0.0  ;;  %v786_v55 = vadd.f32 %v1328_v53, %v609_v46  ;;  %v634_v56 = vpop.f32.mrb[19].mxu0  ;;  %v777_v57 = vpop.f32.mrb[19].mxu1  ;;  %v633_v43 = vadd.f32 %v1790_v41, %v632_v52 }
 0x138   :  { %v917_v58 = vmax.f32 %v775_v51, 0.0  ;;  %v778_v59 = vadd.f32 %v777_v57, %v601_v50 }
 0x139   :  { %v1267_v60 = vpack.c.bf16 %v919_v54, %v919_v54  ;;  %v920_v61 = vmax.f32 %v786_v55, 0.0 }
 0x13a   :  { %v1265_v62 = vpack.c.bf16 %v917_v58, %v917_v58  ;;  %v918_v63 = vmax.f32 %v778_v59, 0.0 }
 0x13b   :  { %1100 = vst.msk [vmem:[%s1995_s3 + $0x8] sm:$0xf] %vm1097_vm1, %v1267_v60  ;;  %v1268_v1 = vpack.c.bf16 %v920_v61, %v920_v61 }
 0x13c   :  { %1098 = vst.msk [vmem:[%s1995_s3] sm:$0xf] %vm1097_vm1, %v1265_v62  ;;  %v1266_v3 = vpack.c.bf16 %v918_v63, %v918_v63  ;;  %v637_v4 = vpop.f32.mrb[20].mxu0  ;;  %v1331_v5 = vpop.f32.mrb[20].mxu1 }
 0x13d   :  { %1101 = vst.msk [vmem:[%s1995_s3 + $0xc] sm:$0xf] %vm1097_vm1, %v1268_v1  ;;  %v799_v7 = vadd.f32 %v1331_v5, %v622_v0  ;;  %v639_v8 = vpop.f32.mrb[21].mxu0  ;;  %v790_v9 = vpop.f32.mrb[21].mxu1  ;;  %v638_v29 = vadd.f32 %v1790_v41, %v637_v4 }
 0x13e   :  { %1099 = vst.msk [vmem:[%s1995_s3 + $0x4] sm:$0xf] %vm1097_vm1, %v1266_v3  ;;  %v791_v12 = vadd.f32 %v790_v9, %v614_v2  ;;  %v640_v13 = vpop.f32.mrb[22].mxu0  ;;  %v1332_v15 = vpop.f32.mrb[22].mxu1 }
 0x13f   :  { %v923_v16 = vmax.f32 %v799_v7, 0.0  ;;  %v802_v17 = vadd.f32 %v1332_v15, %v625_v6  ;;  %v642_v19 = vpop.f32.mrb[23].mxu0  ;;  %v793_v20 = vpop.f32.mrb[23].mxu1  ;;  %v641_v37 = vadd.f32 %v1790_v41, %v640_v13 }
 0x140   :  { %v921_v21 = vmax.f32 %v791_v12, 0.0  ;;  %v794_v23 = vadd.f32 %v793_v20, %v617_v11 }
 0x141   :  { %v1271_v24 = vpack.c.bf16 %v923_v16, %v923_v16  ;;  %v924_v25 = vmax.f32 %v802_v17, 0.0 }
 0x142   :  { %v1269_v27 = vpack.c.bf16 %v921_v21, %v921_v21  ;;  %v922_v28 = vmax.f32 %v794_v23, 0.0 }
 0x143   :  { %1104 = vst.msk [vmem:[%s1995_s3 + $0x18] sm:$0xf] %vm1097_vm1, %v1271_v24  ;;  %v1272_v31 = vpack.c.bf16 %v924_v25, %v924_v25 }
 0x144   :  { %1102 = vst.msk [vmem:[%s1995_s3 + $0x10] sm:$0xf] %vm1097_vm1, %v1269_v27  ;;  %v1270_v33 = vpack.c.bf16 %v922_v28, %v922_v28  ;;  %v645_v35 = vpop.f32.mrb[24].mxu0  ;;  %v1335_v36 = vpop.f32.mrb[24].mxu1 }
 0x145   :  { %1105 = vst.msk [vmem:[%s1995_s3 + $0x1c] sm:$0xf] %vm1097_vm1, %v1272_v31  ;;  %v815_v39 = vadd.f32 %v1335_v36, %v638_v29  ;;  %v647_v40 = vpop.f32.mrb[25].mxu0  ;;  %v806_v42 = vpop.f32.mrb[25].mxu1  ;;  %v646_v58 = vadd.f32 %v1790_v41, %v645_v35 }
 0x146   :  { %1103 = vst.msk [vmem:[%s1995_s3 + $0x14] sm:$0xf] %vm1097_vm1, %v1270_v33  ;;  %v807_v44 = vadd.f32 %v806_v42, %v630_v32  ;;  %v648_v45 = vpop.f32.mrb[26].mxu0  ;;  %v1336_v46 = vpop.f32.mrb[26].mxu1 }
 0x147   :  { %v927_v47 = vmax.f32 %v815_v39, 0.0  ;;  %v818_v48 = vadd.f32 %v1336_v46, %v641_v37  ;;  %v650_v49 = vpop.f32.mrb[27].mxu0  ;;  %v809_v50 = vpop.f32.mrb[27].mxu1  ;;  %v649_v1 = vadd.f32 %v1790_v41, %v648_v45 }
 0x148   :  { %v925_v51 = vmax.f32 %v807_v44, 0.0  ;;  %v810_v53 = vadd.f32 %v809_v50, %v633_v43 }
 0x149   :  { %v1275_v54 = vpack.c.bf16 %v927_v47, %v927_v47  ;;  %v928_v55 = vmax.f32 %v818_v48, 0.0 }
 0x14a   :  { %v1273_v56 = vpack.c.bf16 %v925_v51, %v925_v51  ;;  %v926_v57 = vmax.f32 %v810_v53, 0.0 }
 0x14b   :  { %1108 = vst.msk [vmem:[%s1995_s3 + $0x28] sm:$0xf] %vm1097_vm1, %v1275_v54  ;;  %v1276_v52 = vpack.c.bf16 %v928_v55, %v928_v55 }
 0x14c   :  { %1106 = vst.msk [vmem:[%s1995_s3 + $0x20] sm:$0xf] %vm1097_vm1, %v1273_v56  ;;  %v1274_v59 = vpack.c.bf16 %v926_v57, %v926_v57  ;;  %v653_v60 = vpop.f32.mrb[28].mxu0  ;;  %v1339_v61 = vpop.f32.mrb[28].mxu1 }
 0x14d   :  { %1109 = vst.msk [vmem:[%s1995_s3 + $0x2c] sm:$0xf] %vm1097_vm1, %v1276_v52  ;;  %v654_v62 = vadd.f32 %v1790_v41, %v653_v60  ;;  %v655_v63 = vpop.f32.mrb[29].mxu0  ;;  %v822_v0 = vpop.f32.mrb[29].mxu1 }
 0x14e   :  { %1107 = vst.msk [vmem:[%s1995_s3 + $0x24] sm:$0xf] %vm1097_vm1, %v1274_v59  ;;  %v823_v2 = vadd.f32 %v822_v0, %v646_v58  ;;  %v656_v3 = vpop.f32.mrb[30].mxu0  ;;  %v1340_v4 = vpop.f32.mrb[30].mxu1 }
 0x14f   :  { %v831_v5 = vadd.f32 %v1339_v61, %v654_v62  ;;  %v657_v6 = vadd.f32 %v1790_v41, %v656_v3  ;;  %v658_v7 = vpop.f32.mrb[31].mxu0  ;;  %v825_v8 = vpop.f32.mrb[31].mxu1 }
 0x150   :  { %v929_v9 = vmax.f32 %v823_v2, 0.0  ;;  %v826_v11 = vadd.f32 %v825_v8, %v649_v1 }
 0x151   :  { %v931_v12 = vmax.f32 %v831_v5, 0.0  ;;  %v834_v13 = vadd.f32 %v1340_v4, %v657_v6 }
 0x152   :  { %v1277_v15 = vpack.c.bf16 %v929_v9, %v929_v9  ;;  %v930_v16 = vmax.f32 %v826_v11, 0.0  ;;  %v718_v9 = vadd.f32 %v1790_v41, %v1775_v18 }
 0x153   :  { %v1279_v17 = vpack.c.bf16 %v931_v12, %v931_v12  ;;  %v932_v19 = vmax.f32 %v834_v13, 0.0  ;;  %v710_v13 = vadd.f32 %v1790_v41, %v1771_v10 }
 0x154   :  { %1110 = vst.msk [vmem:[%s1995_s3 + $0x30] sm:$0xf] %vm1097_vm1, %v1277_v15  ;;  %v1278_v20 = vpack.c.bf16 %v930_v16, %v930_v16  ;;  %v661_v21 = vpop.f32.mrb[32].mxu0  ;;  %v1343_v23 = vpop.f32.mrb[32].mxu1 }
 0x155   :  { %1112 = vst.msk [vmem:[%s1995_s3 + $0x38] sm:$0xf] %vm1097_vm1, %v1279_v17  ;;  %v1280_v24 = vpack.c.bf16 %v932_v19, %v932_v19  ;;  %v662_v25 = vadd.f32 %v1790_v41, %v661_v21  ;;  %v663_v27 = vpop.f32.mrb[33].mxu0  ;;  %v838_v28 = vpop.f32.mrb[33].mxu1  ;;  %v721_v17 = vadd.f32 %v1790_v41, %v1777_v22 }
 0x156   :  { %1111 = vst.msk [vmem:[%s1995_s3 + $0x34] sm:$0xf] %vm1097_vm1, %v1278_v20  ;;  %v664_v29 = vpop.f32.mrb[34].mxu0  ;;  %v1344_v31 = vpop.f32.mrb[34].mxu1 }
 0x157   :  { %1113 = vst.msk [vmem:[%s1995_s3 + $0x3c] sm:$0xf] %vm1097_vm1, %v1280_v24  ;;  %v665_v32 = vadd.f32 %v1790_v41, %v664_v29  ;;  %v839_v33 = vadd.f32 %v838_v28, %v662_v25  ;;  %v666_v35 = vpop.f32.mrb[35].mxu0  ;;  %v841_v36 = vpop.f32.mrb[35].mxu1  ;;  %v713_v24 = vadd.f32 %v1790_v41, %v1773_v14 }
 0x159   :  { %v933_v37 = vmax.f32 %v839_v33, 0.0  ;;  %v842_v39 = vadd.f32 %v841_v36, %v665_v32 }
 0x15b   :  { %v1281_v40 = vpack.c.bf16 %v933_v37, %v933_v37  ;;  %v934_v42 = vmax.f32 %v842_v39, 0.0 }
 0x15c   :  { %v669_v43 = vpop.f32.mrb[36].mxu0  ;;  %v1347_v44 = vpop.f32.mrb[36].mxu1 }
 0x15d   :  { %1114 = vst.msk [vmem:[%s1995_s3 + $0x40] sm:$0xf] %vm1097_vm1, %v1281_v40  ;;  %v1282_v45 = vpack.c.bf16 %v934_v42, %v934_v42  ;;  %v670_v46 = vadd.f32 %v1790_v41, %v669_v43  ;;  %v671_v47 = vpop.f32.mrb[37].mxu0  ;;  %v854_v48 = vpop.f32.mrb[37].mxu1 }
 0x15e   :  { %v672_v49 = vpop.f32.mrb[38].mxu0  ;;  %v1348_v50 = vpop.f32.mrb[38].mxu1 }
 0x15f   :  { %1115 = vst.msk [vmem:[%s1995_s3 + $0x44] sm:$0xf] %vm1097_vm1, %v1282_v45  ;;  %v847_v51 = vadd.f32 %v1343_v23, %v670_v46  ;;  %v673_v53 = vadd.f32 %v1790_v41, %v672_v49  ;;  %v674_v54 = vpop.f32.mrb[39].mxu0  ;;  %v857_v55 = vpop.f32.mrb[39].mxu1  ;;  %v734_v45 = vadd.f32 %v1790_v41, %v1783_v34  ;;  %v737_v34 = vadd.f32 %v1790_v41, %v1785_v38 }
 0x161   :  { %v935_v56 = vmax.f32 %v847_v51, 0.0  ;;  %v850_v57 = vadd.f32 %v1344_v31, %v673_v53 }
 0x163   :  { %v1283_v52 = vpack.c.bf16 %v935_v56, %v935_v56  ;;  %v936_v58 = vmax.f32 %v850_v57, 0.0  ;;  %v729_v57 = vadd.f32 %v1790_v41, %v1781_v30 }
 0x164   :  { %v677_v59 = vpop.f32.mrb[40].mxu0  ;;  %v1884_v60 = vpop.f32.mrb[40].mxu1 }
 0x165   :  { %1116 = vst.msk [vmem:[%s1995_s3 + $0x48] sm:$0xf] %vm1097_vm1, %v1283_v52  ;;  %v1284_v61 = vpack.c.bf16 %v936_v58, %v936_v58  ;;  %v678_v62 = vadd.f32 %v1790_v41, %v677_v59  ;;  %v679_v63 = vpop.f32.mrb[41].mxu0  ;;  %v1891_v0 = vpop.f32.mrb[41].mxu1 }
 0x166   :  { %v680_v1 = vpop.f32.mrb[42].mxu0  ;;  %v1893_v2 = vpop.f32.mrb[42].mxu1 }
 0x167   :  { %1117 = vst.msk [vmem:[%s1995_s3 + $0x4c] sm:$0xf] %vm1097_vm1, %v1284_v61  ;;  %v855_v3 = vadd.f32 %v854_v48, %v678_v62  ;;  %v681_v4 = vadd.f32 %v1790_v41, %v680_v1  ;;  %v682_v5 = vpop.f32.mrb[43].mxu0  ;;  %v1900_v6 = vpop.f32.mrb[43].mxu1  ;;  %v726_v48 = vadd.f32 %v1790_v41, %v1779_v26 }
 0x169   :  { %v937_v7 = vmax.f32 %v855_v3, 0.0  ;;  %v858_v8 = vadd.f32 %v857_v55, %v681_v4 }
 0x16b   :  { %v1285_v11 = vpack.c.bf16 %v937_v7, %v937_v7  ;;  %v938_v12 = vmax.f32 %v858_v8, 0.0 }
 0x16c   :  { %v685_v15 = vpop.f32.mrb[44].mxu0  ;;  %v1355_v16 = vpop.f32.mrb[44].mxu1 }
 0x16d   :  { %1118 = vst.msk [vmem:[%s1995_s3 + $0x50] sm:$0xf] %vm1097_vm1, %v1285_v11  ;;  %v1286_v19 = vpack.c.bf16 %v938_v12, %v938_v12  ;;  %v686_v20 = vadd.f32 %v1790_v41, %v685_v15  ;;  %v895_v21 = vadd.f32 %v1355_v16, %v718_v9  ;;  %v687_v18 = vpop.f32.mrb[45].mxu0  ;;  %v886_v23 = vpop.f32.mrb[45].mxu1 }
 0x16e   :  { %v887_v10 = vadd.f32 %v886_v23, %v710_v13  ;;  %v688_v25 = vpop.f32.mrb[46].mxu0  ;;  %v1356_v27 = vpop.f32.mrb[46].mxu1 }
 0x16f   :  { %1119 = vst.msk [vmem:[%s1995_s3 + $0x54] sm:$0xf] %vm1097_vm1, %v1286_v19  ;;  %v863_v22 = vadd.f32 %v1347_v44, %v686_v20  ;;  %v947_v28 = vmax.f32 %v895_v21, 0.0  ;;  %v689_v29 = vadd.f32 %v1790_v41, %v688_v25  ;;  %v898_v31 = vadd.f32 %v1356_v27, %v721_v17  ;;  %v690_v32 = vpop.f32.mrb[47].mxu0  ;;  %v889_v33 = vpop.f32.mrb[47].mxu1 }
 0x170   :  { %v945_v35 = vmax.f32 %v887_v10, 0.0  ;;  %v890_v36 = vadd.f32 %v889_v33, %v713_v24 }
 0x171   :  { %v939_v37 = vmax.f32 %v863_v22, 0.0  ;;  %v1295_v39 = vpack.c.bf16 %v947_v28, %v947_v28  ;;  %v866_v14 = vadd.f32 %v1348_v50, %v689_v29  ;;  %v948_v40 = vmax.f32 %v898_v31, 0.0 }
 0x172   :  { %v1293_v42 = vpack.c.bf16 %v945_v35, %v945_v35  ;;  %v946_v43 = vmax.f32 %v890_v36, 0.0 }
 0x173   :  { %v1287_v46 = vpack.c.bf16 %v939_v37, %v939_v37  ;;  %1128 = vst.msk [vmem:[%s1995_s3 + $0x78] sm:$0xf] %vm1097_vm1, %v1295_v39  ;;  %v940_v44 = vmax.f32 %v866_v14, 0.0  ;;  %v1296_v47 = vpack.c.bf16 %v948_v40, %v948_v40 }
 0x174   :  { %1126 = vst.msk [vmem:[%s1995_s3 + $0x70] sm:$0xf] %vm1097_vm1, %v1293_v42  ;;  %v1294_v49 = vpack.c.bf16 %v946_v43, %v946_v43  ;;  %v693_v50 = vpop.f32.mrb[48].mxu0  ;;  %v1359_v51 = vpop.f32.mrb[48].mxu1 }
 0x175   :  { %1120 = vst.msk [vmem:[%s1995_s3 + $0x58] sm:$0xf] %vm1097_vm1, %v1287_v46  ;;  %v1288_v53 = vpack.c.bf16 %v940_v44, %v940_v44  ;;  %1129 = vst.msk [vmem:[%s1995_s3 + $0x7c] sm:$0xf] %vm1097_vm1, %v1296_v47  ;;  %v694_v26 = vadd.f32 %v1790_v41, %v693_v50  ;;  %v911_v54 = vadd.f32 %v1359_v51, %v734_v45  ;;  %v695_v55 = vpop.f32.mrb[49].mxu0  ;;  %v902_v56 = vpop.f32.mrb[49].mxu1 }
 0x176   :  { %1127 = vst.msk [vmem:[%s1995_s3 + $0x74] sm:$0xf] %vm1097_vm1, %v1294_v49  ;;  %v903_v38 = vadd.f32 %v902_v56, %v726_v48  ;;  %v696_v52 = vpop.f32.mrb[50].mxu0  ;;  %v1360_v58 = vpop.f32.mrb[50].mxu1 }
 0x177   :  { %1121 = vst.msk [vmem:[%s1995_s3 + $0x5c] sm:$0xf] %vm1097_vm1, %v1288_v53  ;;  %v871_v59 = vadd.f32 %v1891_v0, %v694_v26  ;;  %v951_v61 = vmax.f32 %v911_v54, 0.0  ;;  %v697_v62 = vadd.f32 %v1790_v41, %v696_v52  ;;  %v914_v63 = vadd.f32 %v1360_v58, %v737_v34  ;;  %v698_v30 = vpop.f32.mrb[51].mxu0  ;;  %v905_v1 = vpop.f32.mrb[51].mxu1 }
 0x178   :  { %v949_v3 = vmax.f32 %v903_v38, 0.0  ;;  %v906_v4 = vadd.f32 %v905_v1, %v729_v57 }
 0x179   :  { %v941_v5 = vmax.f32 %v871_v59, 0.0  ;;  %v1299_v7 = vpack.c.bf16 %v951_v61, %v951_v61  ;;  %v874_v8 = vadd.f32 %v1900_v6, %v697_v62  ;;  %v952_v9 = vmax.f32 %v914_v63, 0.0 }
 0x17a   :  { %v1297_v11 = vpack.c.bf16 %v949_v3, %v949_v3  ;;  %v950_v12 = vmax.f32 %v906_v4, 0.0 }
 0x17b   :  { %v1289_v13 = vpack.c.bf16 %v941_v5, %v941_v5  ;;  %1132 = vst.msk [vmem:[%s1995_s3 + $0x88] sm:$0xf] %vm1097_vm1, %v1299_v7  ;;  %v942_v0 = vmax.f32 %v874_v8, 0.0  ;;  %v1300_v15 = vpack.c.bf16 %v952_v9, %v952_v9 }
 0x17c   :  { %1130 = vst.msk [vmem:[%s1995_s3 + $0x80] sm:$0xf] %vm1097_vm1, %v1297_v11  ;;  %v1298_v16 = vpack.c.bf16 %v950_v12, %v950_v12  ;;  %v701_v17 = vpop.f32.mrb[52].mxu0 }
 0x17d   :  { %1122 = vst.msk [vmem:[%s1995_s3 + $0x60] sm:$0xf] %vm1097_vm1, %v1289_v13  ;;  %v1290_v6 = vpack.c.bf16 %v942_v0, %v942_v0  ;;  %1133 = vst.msk [vmem:[%s1995_s3 + $0x8c] sm:$0xf] %vm1097_vm1, %v1300_v15  ;;  %v702_v19 = vadd.f32 %v1790_v41, %v701_v17  ;;  %v703_v20 = vpop.f32.mrb[53].mxu0 }
 0x17e   :  { %1131 = vst.msk [vmem:[%s1995_s3 + $0x84] sm:$0xf] %vm1097_vm1, %v1298_v16  ;;  %v704_v21 = vpop.f32.mrb[54].mxu0 }
 0x17f   :  { %1123 = vst.msk [vmem:[%s1995_s3 + $0x64] sm:$0xf] %vm1097_vm1, %v1290_v6  ;;  %v879_v18 = vadd.f32 %v1884_v60, %v702_v19  ;;  %v705_v23 = vadd.f32 %v1790_v41, %v704_v21  ;;  %v706_v24 = vpop.f32.mrb[55].mxu0 }
 0x181   :  { %v943_v10 = vmax.f32 %v879_v18, 0.0  ;;  %v882_v25 = vadd.f32 %v1893_v2, %v705_v23 }
 0x183   :  { %v1291_v27 = vpack.c.bf16 %v943_v10, %v943_v10  ;;  %v944_v22 = vmax.f32 %v882_v25, 0.0 }
 0x185   :  { %1124 = vst.msk [vmem:[%s1995_s3 + $0x68] sm:$0xf] %vm1097_vm1, %v1291_v27  ;;  %v1292_v28 = vpack.c.bf16 %v944_v22, %v944_v22 }
 0x187   :  { %1125 = vst.msk [vmem:[%s1995_s3 + $0x6c] sm:$0xf] %vm1097_vm1, %v1292_v28 }

</bundles_post_ra>
